<compile_context>
chip_gen: v5e
topology: v5e:2x2
jax: 0.10.0
libtpu: 0.0.40
codegen_flags: <defaults>
</compile_context>

<pallas_src>
import jax
import jax.numpy as jnp
from jax.experimental import pallas as pl
from jax.experimental.pallas import tpu as pltpu

# ---------------- hyperparameters implied by the module ----------------
N_CLASSES = 10
CHANNELS = 1
IMAGE_SIZE = 8
DEPTH = 512                                    # self.depth
IMG_FLAT = CHANNELS * IMAGE_SIZE * IMAGE_SIZE  # prod(img_shape) = 64
D_IN = N_CLASSES + IMG_FLAT                    # 74 (true PyTorch fan-in)

LANE = 128
SUBLANE = 8
ONEHOT_PAD = 64            # one-hot width appended after the 64 image features
K_IN = IMG_FLAT + ONEHOT_PAD    # 128-wide merged layer-1 input
OUT_PAD = LANE             # Linear(512, 1) weight padded to 128 lanes for the MXU
OUT_W = 8                  # HBM writeback width (lane 0 is the real output)
MAX_TILE_B = 512           # per-step VMEM stays ~2.5 MiB even double-buffered

assert K_IN == LANE and N_CLASSES <= ONEHOT_PAD


def _round_up(x, m):
    return (x + m - 1) // m * m


def _tile_and_pad(B):
    """Pick batch tile: as large as possible, but >= 2 grid steps when the
    batch allows it so both v7x TensorCores get work."""
    b_pad0 = _round_up(max(B, SUBLANE), SUBLANE)
    if b_pad0 <= SUBLANE:
        tile_b = SUBLANE
    else:
        half = _round_up((b_pad0 + 1) // 2, SUBLANE)
        tile_b = min(MAX_TILE_B, half)
    b_pad = _round_up(B, tile_b)
    return tile_b, b_pad


# ---------------------------- Pallas kernel ----------------------------
def _disc_kernel(x_ref, w1_ref, b123_ref, w2_ref, w3_ref, w4_ref, b4_ref,
                 out_ref):
    f32 = jnp.float32
    bf16 = jnp.bfloat16

    def lrelu(h):                       # f32 VPU math (works on v5e too)
        return jnp.maximum(h, 0.2 * h)

    def bdot(a, w_ref):                 # bf16 inputs, f32 MXU accumulate
        return jnp.dot(a.astype(bf16), w_ref[...], preferred_element_type=f32)

    # Layer 1: Linear(D_in, 512) + LeakyReLU(0.2)
    #   (Embedding gather + concat folded into w1 at init; single K=128 matmul)
    h = lrelu(bdot(x_ref[...], w1_ref) + b123_ref[0:1, :])

    # Layers 2/3: Linear(512, 512) + Dropout(identity in eval) + LeakyReLU(0.2)
    h = lrelu(bdot(h, w2_ref) + b123_ref[1:2, :])
    h = lrelu(bdot(h, w3_ref) + b123_ref[2:3, :])

    # Layer 4: Linear(512, 1) + Sigmoid (lane 0 is the real output; writeback
    # narrowed to 8 lanes). Stable sigmoid on the EUP: 0.5*tanh(0.5*x)+0.5.
    o = bdot(h, w4_ref) + b4_ref[...]
    out_ref[...] = 0.5 * jnp.tanh(0.5 * o[:, :OUT_W]) + 0.5


# ------------------------------ wrapper --------------------------------
@jax.jit
def discriminator_forward(img, labels, params):
    """img: (B, C, H, W) float32 (NCHW, matches PyTorch); labels: (B,) int32."""
    B = img.shape[0]
    tile_b, b_pad = _tile_and_pad(B)
    grid = (b_pad // tile_b,)

    # Input glue (fuses into one XLA op chain): flatten + bf16 cast + one-hot
    # concat + batch pad.  NB: out-of-range labels silently yield a zero
    # embedding contribution (PyTorch nn.Embedding would raise).
    imgs = img.reshape(B, -1).astype(jnp.bfloat16)                    # (B, 64)
    onehot = jax.nn.one_hot(labels.astype(jnp.int32), ONEHOT_PAD,
                            dtype=jnp.bfloat16)                       # (B, 64)
    x = jnp.concatenate([imgs, onehot], axis=-1)                      # (B, 128)
    x = jnp.pad(x, ((0, b_pad - B), (0, 0)))

    def row_spec(shape):    # batch-tiled blocks (pipelined / double-buffered)
        return pl.BlockSpec(shape, lambda i: (i, 0))

    def const_spec(shape):  # constant block index -> resident across the grid
        return pl.BlockSpec(shape, lambda i: (0, 0))

    flops = int(2 * b_pad * (K_IN * DEPTH + 2 * DEPTH * DEPTH + DEPTH * OUT_PAD))
    bytes_accessed = int(
        b_pad * (K_IN * 2 + OUT_W * 4)                                 # acts in/out
        + (K_IN * DEPTH + 2 * DEPTH * DEPTH + DEPTH * OUT_PAD) * 2     # bf16 weights
        + (3 * DEPTH + OUT_PAD) * 4)                                   # f32 biases

    out_pad = pl.pallas_call(
        _disc_kernel,
        out_shape=jax.ShapeDtypeStruct((b_pad, OUT_W), jnp.float32),
        grid=grid,
        in_specs=[
            row_spec((tile_b, K_IN)),            # merged input tile (bf16)
            const_spec((K_IN, DEPTH)),           # w1 (embed folded in, bf16)
            const_spec((3, DEPTH)),              # b1/b2/b3 packed (f32)
            const_spec((DEPTH, DEPTH)),          # w2 (bf16)
            const_spec((DEPTH, DEPTH)),          # w3 (bf16)
            const_spec((DEPTH, OUT_PAD)),        # w4 (bf16, lane-padded)
            const_spec((1, OUT_PAD)),            # b4 (f32, lane-padded)
        ],
        out_specs=row_spec((tile_b, OUT_W)),
        compiler_params=pltpu.CompilerParams(
            dimension_semantics=("parallel",)),
        cost_estimate=pl.CostEstimate(flops=flops,
                                      transcendentals=int(b_pad * OUT_W),
                                      bytes_accessed=bytes_accessed),
    )(x,
      params["w1"], params["b123"],
      params["w2"], params["w3"],
      params["w4"], params["b4"])

    return out_pad[:B, :1]                                             # (B, 1)


# -------------------- deterministic parameter init ---------------------
def init_params(key):
    ks = jax.random.split(key, 9)

    def linear(kw, kb, fan_in, fan_out):
        # PyTorch default init: U(-1/sqrt(fan_in), 1/sqrt(fan_in))
        bound = 1.0 / (fan_in ** 0.5)
        w = jax.random.uniform(kw, (fan_in, fan_out), jnp.float32, -bound, bound)
        b = jax.random.uniform(kb, (1, fan_out), jnp.float32, -bound, bound)
        return w, b

    embed = jax.random.normal(ks[0], (N_CLASSES, N_CLASSES), jnp.float32)
    w1, b1 = linear(ks[1], ks[2], D_IN, DEPTH)
    w2, b2 = linear(ks[3], ks[4], DEPTH, DEPTH)
    w3, b3 = linear(ks[5], ks[6], DEPTH, DEPTH)
    w4, b4 = linear(ks[7], ks[8], DEPTH, 1)

    # Fold Embedding into layer 1 and merge into one K=128 weight:
    #   rows [0, 64)   = image rows of w1
    #   rows [64, 74)  = embed @ w1[64:74]   (one-hot in the input selects a row)
    #   rows [74, 128) = 0
    w1e_folded = embed @ w1[IMG_FLAT:, :]                           # (10, 512) f32
    w1_full = jnp.zeros((K_IN, DEPTH), jnp.float32)
    w1_full = w1_full.at[:IMG_FLAT].set(w1[:IMG_FLAT])
    w1_full = w1_full.at[IMG_FLAT:IMG_FLAT + N_CLASSES].set(w1e_folded)

    b123 = jnp.concatenate([b1, b2, b3], axis=0)                    # (3, 512) f32
    w4_pad = jnp.pad(w4, ((0, 0), (0, OUT_PAD - 1)))
    b4_pad = jnp.pad(b4, ((0, 0), (0, OUT_PAD - 1)))

    # bf16 weights (halved DMA, 2x MXU rate); biases stay f32.
    return dict(w1=w1_full.astype(jnp.bfloat16),
                w2=w2.astype(jnp.bfloat16),
                w3=w3.astype(jnp.bfloat16),
                w4=w4_pad.astype(jnp.bfloat16),
                b123=b123, b4=b4_pad)


# ---------------------------- reference (JAX) ---------------------------
def reference_forward(img, labels, params):
    """Pure-JAX reference with the same folded / bf16-weight / f32-acc numerics.
    NOTE: bf16 weights deviate slightly (~1e-3 relative) from the f32 PyTorch
    module; this reference shares the casts so the check isolates kernel bugs."""
    B = img.shape[0]
    f32, bf16 = jnp.float32, jnp.bfloat16
    imgs = img.reshape(B, -1).astype(bf16)
    onehot = jax.nn.one_hot(labels.astype(jnp.int32), ONEHOT_PAD, dtype=bf16)
    x = jnp.concatenate([imgs, onehot], axis=-1)

    def lrelu(h):
        return jnp.maximum(h, 0.2 * h)

    def bdot(a, w):
        return jnp.dot(a.astype(bf16), w, preferred_element_type=f32)

    h = lrelu(bdot(x, params["w1"]) + params["b123"][0:1])
    h = lrelu(bdot(h, params["w2"]) + params["b123"][1:2])
    h = lrelu(bdot(h, params["w3"]) + params["b123"][2:3])
    o = bdot(h, params["w4"][:, :1]) + params["b4"][:, :1]
    return jax.nn.sigmoid(o)


if __name__ == "__main__":
    key = jax.random.PRNGKey(0)
    k_img, k_lab, k_par = jax.random.split(key, 3)
    params = init_params(k_par)

    # Small single-tile case (B=4, C=1, H=W=8).
    B = 4
    img = jax.random.normal(k_img, (B, CHANNELS, IMAGE_SIZE, IMAGE_SIZE),
                            jnp.float32)
    labels = jax.random.randint(k_lab, (B,), 0, N_CLASSES, jnp.int32)

    validity = jax.block_until_ready(discriminator_forward(img, labels, params))
    ref = reference_forward(img, labels, params)
    assert validity.shape == (B, 1)
    assert jnp.allclose(validity, ref, atol=2e-3, rtol=2e-3)

    # Multi-tile case (exercises grid > 1 and batch padding).
    B2 = 48
    img2 = jax.random.normal(k_img, (B2, CHANNELS, IMAGE_SIZE, IMAGE_SIZE),
                             jnp.float32)
    labels2 = jax.random.randint(k_lab, (B2,), 0, N_CLASSES, jnp.int32)
    validity2 = jax.block_until_ready(discriminator_forward(img2, labels2, params))
    ref2 = reference_forward(img2, labels2, params)
    assert validity2.shape == (B2, 1)
    assert jnp.allclose(validity2, ref2, atol=2e-3, rtol=2e-3)

    print("KERNEL_OK")
</pallas_src>

<mosaic_0001>
module attributes {stable_mosaic.version = 11 : i64} {
  func.func @_disc_kernel(%arg0: i32, %arg1: memref<8x128xbf16, #tpu.memory_space<vmem>>, %arg2: memref<128x512xbf16, #tpu.memory_space<vmem>>, %arg3: memref<3x512xf32, #tpu.memory_space<vmem>>, %arg4: memref<512x512xbf16, #tpu.memory_space<vmem>>, %arg5: memref<512x512xbf16, #tpu.memory_space<vmem>>, %arg6: memref<512x128xbf16, #tpu.memory_space<vmem>>, %arg7: memref<1x128xf32, #tpu.memory_space<vmem>>, %arg8: memref<8x8xf32, #tpu.memory_space<vmem>>) attributes {dimension_semantics = [#tpu.dimension_semantics<parallel>], iteration_bounds = array<i64: 1>, scalar_prefetch = 0 : i64, scratch_operands = 0 : i64, tpu.core_type = #tpu.core_type<tc>, window_params = [{transform_indices = @transform_0, window_bounds = array<i64: 8, 128>}, {pipeline_mode = #tpu.pipeline_mode<synchronous>, transform_indices = @transform_1, window_bounds = array<i64: 128, 512>}, {pipeline_mode = #tpu.pipeline_mode<synchronous>, transform_indices = @transform_2, window_bounds = array<i64: 3, 512>}, {pipeline_mode = #tpu.pipeline_mode<synchronous>, transform_indices = @transform_3, window_bounds = array<i64: 512, 512>}, {pipeline_mode = #tpu.pipeline_mode<synchronous>, transform_indices = @transform_4, window_bounds = array<i64: 512, 512>}, {pipeline_mode = #tpu.pipeline_mode<synchronous>, transform_indices = @transform_5, window_bounds = array<i64: 512, 128>}, {pipeline_mode = #tpu.pipeline_mode<synchronous>, transform_indices = @transform_6, window_bounds = array<i64: 1, 128>}, {transform_indices = @transform_7, window_bounds = array<i64: 8, 8>}]} {
    %c0 = arith.constant 0 : index
    %c0_0 = arith.constant 0 : index
    %0 = vector.load %arg1[%c0, %c0_0] : memref<8x128xbf16, #tpu.memory_space<vmem>>, vector<8x128xbf16>
    %c0_1 = arith.constant 0 : index
    %c0_2 = arith.constant 0 : index
    %1 = vector.load %arg2[%c0_1, %c0_2] : memref<128x512xbf16, #tpu.memory_space<vmem>>, vector<128x512xbf16>
    %cst = arith.constant dense<0.000000e+00> : vector<8x512xf32>
    %2 = tpu.matmul %0, %1, %cst {dimension_numbers = #tpu.dot_dimension_numbers<[1], [0], [0], [1], [0, 0, 1, 1], [], []>} : vector<8x128xbf16>, vector<128x512xbf16>, vector<8x512xf32> -> vector<8x512xf32>
    %c0_3 = arith.constant 0 : index
    %c0_4 = arith.constant 0 : index
    %3 = vector.load %arg3[%c0_3, %c0_4] : memref<3x512xf32, #tpu.memory_space<vmem>>, vector<1x512xf32>
    %4 = vector.broadcast %3 : vector<1x512xf32> to vector<8x512xf32>
    %5 = arith.addf %2, %4 : vector<8x512xf32>
    %cst_5 = arith.constant 2.000000e-01 : f32
    %6 = vector.broadcast %cst_5 : f32 to vector<8x512xf32>
    %7 = arith.mulf %6, %5 : vector<8x512xf32>
    %8 = arith.maximumf %5, %7 : vector<8x512xf32>
    %9 = arith.truncf %8 : vector<8x512xf32> to vector<8x512xbf16>
    %c0_6 = arith.constant 0 : index
    %c0_7 = arith.constant 0 : index
    %10 = vector.load %arg4[%c0_6, %c0_7] : memref<512x512xbf16, #tpu.memory_space<vmem>>, vector<512x512xbf16>
    %cst_8 = arith.constant dense<0.000000e+00> : vector<8x512xf32>
    %11 = tpu.matmul %9, %10, %cst_8 {dimension_numbers = #tpu.dot_dimension_numbers<[1], [0], [0], [1], [0, 0, 1, 1], [], []>} : vector<8x512xbf16>, vector<512x512xbf16>, vector<8x512xf32> -> vector<8x512xf32>
    %c1 = arith.constant 1 : index
    %c0_9 = arith.constant 0 : index
    %12 = vector.load %arg3[%c1, %c0_9] : memref<3x512xf32, #tpu.memory_space<vmem>>, vector<1x512xf32>
    %13 = vector.broadcast %12 : vector<1x512xf32> to vector<8x512xf32>
    %14 = arith.addf %11, %13 : vector<8x512xf32>
    %cst_10 = arith.constant 2.000000e-01 : f32
    %15 = vector.broadcast %cst_10 : f32 to vector<8x512xf32>
    %16 = arith.mulf %15, %14 : vector<8x512xf32>
    %17 = arith.maximumf %14, %16 : vector<8x512xf32>
    %18 = arith.truncf %17 : vector<8x512xf32> to vector<8x512xbf16>
    %c0_11 = arith.constant 0 : index
    %c0_12 = arith.constant 0 : index
    %19 = vector.load %arg5[%c0_11, %c0_12] : memref<512x512xbf16, #tpu.memory_space<vmem>>, vector<512x512xbf16>
    %cst_13 = arith.constant dense<0.000000e+00> : vector<8x512xf32>
    %20 = tpu.matmul %18, %19, %cst_13 {dimension_numbers = #tpu.dot_dimension_numbers<[1], [0], [0], [1], [0, 0, 1, 1], [], []>} : vector<8x512xbf16>, vector<512x512xbf16>, vector<8x512xf32> -> vector<8x512xf32>
    %c2 = arith.constant 2 : index
    %c0_14 = arith.constant 0 : index
    %21 = vector.load %arg3[%c2, %c0_14] : memref<3x512xf32, #tpu.memory_space<vmem>>, vector<1x512xf32>
    %22 = vector.broadcast %21 : vector<1x512xf32> to vector<8x512xf32>
    %23 = arith.addf %20, %22 : vector<8x512xf32>
    %cst_15 = arith.constant 2.000000e-01 : f32
    %24 = vector.broadcast %cst_15 : f32 to vector<8x512xf32>
    %25 = arith.mulf %24, %23 : vector<8x512xf32>
    %26 = arith.maximumf %23, %25 : vector<8x512xf32>
    %27 = arith.truncf %26 : vector<8x512xf32> to vector<8x512xbf16>
    %c0_16 = arith.constant 0 : index
    %c0_17 = arith.constant 0 : index
    %28 = vector.load %arg6[%c0_16, %c0_17] : memref<512x128xbf16, #tpu.memory_space<vmem>>, vector<512x128xbf16>
    %cst_18 = arith.constant dense<0.000000e+00> : vector<8x128xf32>
    %29 = tpu.matmul %27, %28, %cst_18 {dimension_numbers = #tpu.dot_dimension_numbers<[1], [0], [0], [1], [0, 0, 1, 1], [], []>} : vector<8x512xbf16>, vector<512x128xbf16>, vector<8x128xf32> -> vector<8x128xf32>
    %c0_19 = arith.constant 0 : index
    %c0_20 = arith.constant 0 : index
    %30 = vector.load %arg7[%c0_19, %c0_20] : memref<1x128xf32, #tpu.memory_space<vmem>>, vector<1x128xf32>
    %31 = vector.broadcast %30 : vector<1x128xf32> to vector<8x128xf32>
    %32 = arith.addf %29, %31 : vector<8x128xf32>
    %33 = vector.extract_strided_slice %32 {offsets = [0, 0], sizes = [8, 8], strides = [1, 1]} : vector<8x128xf32> to vector<8x8xf32>
    %cst_21 = arith.constant 5.000000e-01 : f32
    %34 = vector.broadcast %cst_21 : f32 to vector<8x8xf32>
    %35 = arith.mulf %34, %33 : vector<8x8xf32>
    %36 = math.tanh %35 : vector<8x8xf32>
    %cst_22 = arith.constant 5.000000e-01 : f32
    %37 = vector.broadcast %cst_22 : f32 to vector<8x8xf32>
    %38 = arith.mulf %37, %36 : vector<8x8xf32>
    %cst_23 = arith.constant 5.000000e-01 : f32
    %39 = vector.broadcast %cst_23 : f32 to vector<8x8xf32>
    %40 = arith.addf %38, %39 : vector<8x8xf32>
    %c0_24 = arith.constant 0 : index
    %c0_25 = arith.constant 0 : index
    %41 = vector.load %arg8[%c0_24, %c0_25] : memref<8x8xf32, #tpu.memory_space<vmem>>, vector<8x8xf32>
    tpu.vector_store %arg8[%c0_24, %c0_25], %40 {strides = array<i32>} : memref<8x8xf32, #tpu.memory_space<vmem>>, vector<8x8xf32>,
    return
  }
  func.func @transform_0(%arg0: i32) -> (i32, i32) {
    %c0_i32 = arith.constant 0 : i32
    %c0_i32_0 = arith.constant 0 : i32
    return %arg0, %c0_i32 : i32, i32
  }
  func.func @transform_1(%arg0: i32) -> (i32, i32) {
    %c0_i32 = arith.constant 0 : i32
    %c0_i32_0 = arith.constant 0 : i32
    %c0_i32_1 = arith.constant 0 : i32
    return %c0_i32, %c0_i32_0 : i32, i32
  }
  func.func @transform_2(%arg0: i32) -> (i32, i32) {
    %c0_i32 = arith.constant 0 : i32
    %c0_i32_0 = arith.constant 0 : i32
    %c0_i32_1 = arith.constant 0 : i32
    return %c0_i32, %c0_i32_0 : i32, i32
  }
  func.func @transform_3(%arg0: i32) -> (i32, i32) {
    %c0_i32 = arith.constant 0 : i32
    %c0_i32_0 = arith.constant 0 : i32
    %c0_i32_1 = arith.constant 0 : i32
    return %c0_i32, %c0_i32_0 : i32, i32
  }
  func.func @transform_4(%arg0: i32) -> (i32, i32) {
    %c0_i32 = arith.constant 0 : i32
    %c0_i32_0 = arith.constant 0 : i32
    %c0_i32_1 = arith.constant 0 : i32
    return %c0_i32, %c0_i32_0 : i32, i32
  }
  func.func @transform_5(%arg0: i32) -> (i32, i32) {
    %c0_i32 = arith.constant 0 : i32
    %c0_i32_0 = arith.constant 0 : i32
    %c0_i32_1 = arith.constant 0 : i32
    return %c0_i32, %c0_i32_0 : i32, i32
  }
  func.func @transform_6(%arg0: i32) -> (i32, i32) {
    %c0_i32 = arith.constant 0 : i32
    %c0_i32_0 = arith.constant 0 : i32
    %c0_i32_1 = arith.constant 0 : i32
    return %c0_i32, %c0_i32_0 : i32, i32
  }
  func.func @transform_7(%arg0: i32) -> (i32, i32) {
    %c0_i32 = arith.constant 0 : i32
    %c0_i32_0 = arith.constant 0 : i32
    return %arg0, %c0_i32 : i32, i32
  }
}

</mosaic_0001>

<bundles_post_ra>
// kernel: discriminator_forward.1
= control target key start
LH: loop header
LB: loop body
LE: loop exit
PB: predicated region body
PF: predicated region fallthrough
CT: control target
= control target key end

     0   :  { %12 = vsyncpa [#allocation3], 0  ;;  %s4547_s0 = inlined_call_operand.vmem [shape: bf16[8,128], index: 0, kind: input, shape index: {}]   ;;  %s4548_s1 = inlined_call_operand.hbm [shape: bf16[128,512], index: 1, kind: input, shape index: {}]   ;;  %s4549_s2 = inlined_call_operand.vmem [shape: f32[3,512], index: 2, kind: input, shape index: {}]   ;;  %s4550_s3 = inlined_call_operand.hbm [shape: bf16[512,512], index: 3, kind: input, shape index: {}]   ;;  %s4551_s4 = inlined_call_operand.hbm [shape: bf16[512,512], index: 4, kind: input, shape index: {}]   ;;  %s4552_s5 = inlined_call_operand.hbm [shape: bf16[512,128], index: 5, kind: input, shape index: {}]   ;;  %s4553_s6 = inlined_call_operand.vmem [shape: f32[1,128], index: 6, kind: input, shape index: {}]   ;;  %s4554_s7 = inlined_call_operand.vmem [shape: f32[8,8], index: 7, kind: output, shape index: {}]  }
   0x1   :  { %13 = vsyncpa [#allocation5], 0 }
   0x2   :  { %14 = vsyncpa [#allocation8], 0  ;;  %s36_s26 = sshll.u32 %s4550_s3, 4  ;;  %s4394_s27 = smov [#allocation4]   ;;  %s37_s26 = int_to_ptr.hbm [resolvable:$true] %s36_s26 }
   0x3   :  { %s38_s28 = sshll.u32 %s4394_s27, 4  ;;  %s21_s8 = sshll.u32 %s4548_s1, 4  ;;  %s39_s28 = int_to_ptr.vmem [resolvable:$true] %s38_s28  ;;  %s22_s8 = int_to_ptr.hbm [resolvable:$true] %s21_s8 }
   0x4   :  { %s4395_s9 = smov 256   ;;  %s4396_s10 = smov 16  }
   0x5   :  { %44 = dma.hbm_to_vmem [thread:$0]  %s37_s26, 16384, %s39_s28, [#allocation5], %s4395_s9, %s4395_s9, %s4396_s10  }
   0x6   :  { %s4397_s11 = smov [#allocation2]   ;;  %s49_s15 = sshll.u32 %s4551_s4, 4  ;;  %s50_s15 = int_to_ptr.hbm [resolvable:$true] %s49_s15 }
   0x7   :  { %s23_s12 = sshll.u32 %s4397_s11, 4  ;;  %s62_s17 = sshll.u32 %s4552_s5, 4  ;;  %s24_s12 = int_to_ptr.vmem [resolvable:$true] %s23_s12  ;;  %s63_s17 = int_to_ptr.hbm [resolvable:$true] %s62_s17 }
   0x8   :  { %29 = dma.hbm_to_vmem [thread:$0]  %s22_s8, 4096, %s24_s12, [#allocation3], %s4395_s9, %s4395_s9, %s4396_s10  }
   0x9   :  { %s4398_s18 = smov [#allocation6]   ;;  %s4399_s1 = smov [#allocation7]  }
   0xa   :  { %s51_s19 = sshll.u32 %s4398_s18, 4  ;;  %s64_s20 = sshll.u32 %s4399_s1, 4  ;;  %s52_s19 = int_to_ptr.vmem [resolvable:$true] %s51_s19  ;;  %s65_s20 = int_to_ptr.vmem [resolvable:$true] %s64_s20 }
   0xb   :  { %57 = dma.hbm_to_vmem [thread:$0]  %s50_s15, 16384, %s52_s19, [#allocation5], %s4395_s9, %s4395_s9, %s4396_s10  }
   0xc   :  { %s4400_s21 = smov 64   ;;  %s4401_s22 = smov 4  }
   0xd   :  { %70 = dma.hbm_to_vmem [thread:$0]  %s63_s17, 4096, %s65_s20, [#allocation8], %s4400_s21, %s4400_s21, %s4401_s22  }
   0xe   :  { %4388 = dma.done.wait [#allocation3], 4096  }
   0xf   :  { %4389 = vsyncadd [#allocation3], 4294963200 }
  0x10   :  { %4390 = dma.done.wait [#allocation5], 32768  }
  0x11   :  { %4391 = vsyncadd [#allocation5], 4294934528 }
  0x12   :  { %4392 = dma.done.wait [#allocation8], 4096  }
  0x13   :  { %4393 = vsyncadd [#allocation8], 4294963200  ;;  %v2793_v0 = vld [vmem:[#allocation2 + $0xe0] sm:$0xf]  ;;  %v3991_v1 = vld [vmem:[#allocation2 + $0xec] sm:$0xf0] }
  0x14   :  { %v3989_v2 = vld [vmem:[#allocation2 + $0xe4] sm:$0xf]  ;;  %v2794_v3 = vor.u32 %v3991_v1, %v2793_v0  ;;  %v2795_v4 = vld [vmem:[#allocation2 + $0xf0] sm:$0xf0]  ;;  %v2801_v5 = vld [vmem:[#allocation2 + $0xe8] sm:$0xf] }
  0x15   :  { %v3992_v6 = vld [vmem:[#allocation2 + $0xf4] sm:$0xf0]  ;;  %v2798_v7 = vor.u32 %v3989_v2, %v2795_v4  ;;  %v3990_v9 = vld [vmem:[#allocation2 + $0xec] sm:$0xf]  ;;  %v2803_v10 = vld [vmem:[#allocation2 + $0xf8] sm:$0xf0] }
  0x16   :  { %v2802_v8 = vor.u32 %v3992_v6, %v2801_v5  ;;  %v2777_v11 = vld [vmem:[#allocation2 + $0xc0] sm:$0xf]  ;;  %292 = vmatpush.bf16.msra.mxu0 %v2794_v3  ;;  %v2806_v12 = vor.u32 %v3990_v9, %v2803_v10  ;;  %v3987_v13 = vld [vmem:[#allocation2 + $0xcc] sm:$0xf0]  ;;  %v3985_v14 = vld [vmem:[#allocation2 + $0xc4] sm:$0xf] }
  0x17   :  { %v2779_v15 = vld [vmem:[#allocation2 + $0xd0] sm:$0xf0]  ;;  %305 = vmatpush.bf16.msra.mxu1 %v2798_v7  ;;  %v2778_v16 = vor.u32 %v3987_v13, %v2777_v11  ;;  %v2785_v18 = vld [vmem:[#allocation2 + $0xc8] sm:$0xf]  ;;  %v3988_v19 = vld [vmem:[#allocation2 + $0xd4] sm:$0xf0] }
  0x18   :  { %318 = vmatpush.bf16.msra.mxu2 %v2802_v8  ;;  %v2782_v17 = vor.u32 %v3985_v14, %v2779_v15  ;;  %v3986_v20 = vld [vmem:[#allocation2 + $0xcc] sm:$0xf]  ;;  %331 = vmatpush.bf16.msra.mxu3 %v2806_v12  ;;  %v2786_v21 = vor.u32 %v3988_v19, %v2785_v18  ;;  %v2787_v22 = vld [vmem:[#allocation2 + $0xd8] sm:$0xf0]  ;;  %v2761_v23 = vld [vmem:[#allocation2 + $0xa0] sm:$0xf] }
  0x19   :  { %v3983_v24 = vld [vmem:[#allocation2 + $0xac] sm:$0xf0]  ;;  %v2790_v25 = vor.u32 %v3986_v20, %v2787_v22  ;;  %v3981_v26 = vld [vmem:[#allocation2 + $0xa4] sm:$0xf]  ;;  %v2763_v27 = vld [vmem:[#allocation2 + $0xb0] sm:$0xf0] }
  0x1a   :  { %v2769_v28 = vld [vmem:[#allocation2 + $0xa8] sm:$0xf]  ;;  %293 = vmatpush.bf16.msra.mxu0 %v2778_v16  ;;  %v2762_v29 = vor.u32 %v3983_v24, %v2761_v23  ;;  %v3984_v30 = vld [vmem:[#allocation2 + $0xb4] sm:$0xf0]  ;;  %v3982_v31 = vld [vmem:[#allocation2 + $0xac] sm:$0xf]  ;;  %v2766_v33 = vor.u32 %v3981_v26, %v2763_v27 }
  0x1b   :  { %v2771_v32 = vld [vmem:[#allocation2 + $0xb8] sm:$0xf0]  ;;  %306 = vmatpush.bf16.msra.mxu1 %v2782_v17  ;;  %v2770_v34 = vor.u32 %v3984_v30, %v2769_v28  ;;  %v2745_v35 = vld [vmem:[#allocation2 + $0x80] sm:$0xf]  ;;  %v3979_v36 = vld [vmem:[#allocation2 + $0x8c] sm:$0xf0] }
  0x1c   :  { %319 = vmatpush.bf16.msra.mxu2 %v2786_v21  ;;  %v3977_v37 = vld [vmem:[#allocation2 + $0x84] sm:$0xf]  ;;  %332 = vmatpush.bf16.msra.mxu3 %v2790_v25  ;;  %v2774_v38 = vor.u32 %v3982_v31, %v2771_v32  ;;  %v2747_v39 = vld [vmem:[#allocation2 + $0x90] sm:$0xf0]  ;;  %v2753_v40 = vld [vmem:[#allocation2 + $0x88] sm:$0xf]  ;;  %v2746_v44 = vor.u32 %v3979_v36, %v2745_v35 }
  0x1d   :  { %v3980_v41 = vld [vmem:[#allocation2 + $0x94] sm:$0xf0]  ;;  %v3978_v42 = vld [vmem:[#allocation2 + $0x8c] sm:$0xf]  ;;  %v2755_v43 = vld [vmem:[#allocation2 + $0x98] sm:$0xf0]  ;;  %v2750_v45 = vor.u32 %v3977_v37, %v2747_v39 }
  0x1e   :  { %294 = vmatpush.bf16.msra.mxu0 %v2762_v29  ;;  %v2754_v46 = vor.u32 %v3980_v41, %v2753_v40  ;;  %v2729_v47 = vld [vmem:[#allocation2 + $0x60] sm:$0xf]  ;;  %v3975_v48 = vld [vmem:[#allocation2 + $0x6c] sm:$0xf0]  ;;  %v3973_v49 = vld [vmem:[#allocation2 + $0x64] sm:$0xf]  ;;  %v2758_v50 = vor.u32 %v3978_v42, %v2755_v43 }
  0x1f   :  { %307 = vmatpush.bf16.msra.mxu1 %v2766_v33  ;;  %v2731_v51 = vld [vmem:[#allocation2 + $0x70] sm:$0xf0]  ;;  %v2737_v52 = vld [vmem:[#allocation2 + $0x68] sm:$0xf]  ;;  %v3976_v53 = vld [vmem:[#allocation2 + $0x74] sm:$0xf0]  ;;  %v2730_v56 = vor.u32 %v3975_v48, %v2729_v47 }
  0x20   :  { %320 = vmatpush.bf16.msra.mxu2 %v2770_v34  ;;  %333 = vmatpush.bf16.msra.mxu3 %v2774_v38  ;;  %v3974_v54 = vld [vmem:[#allocation2 + $0x6c] sm:$0xf]  ;;  %v2739_v55 = vld [vmem:[#allocation2 + $0x78] sm:$0xf0]  ;;  %v2734_v57 = vor.u32 %v3973_v49, %v2731_v51  ;;  %v2738_v58 = vor.u32 %v3976_v53, %v2737_v52  ;;  %v2713_v59 = vld [vmem:[#allocation2 + $0x40] sm:$0xf] }
  0x21   :  { %v3971_v60 = vld [vmem:[#allocation2 + $0x4c] sm:$0xf0]  ;;  %v3969_v61 = vld [vmem:[#allocation2 + $0x44] sm:$0xf]  ;;  %v2742_v62 = vor.u32 %v3974_v54, %v2739_v55  ;;  %v2715_v63 = vld [vmem:[#allocation2 + $0x50] sm:$0xf0] }
  0x22   :  { %295 = vmatpush.bf16.msra.mxu0 %v2746_v44  ;;  %v2721_v0 = vld [vmem:[#allocation2 + $0x48] sm:$0xf]  ;;  %v3972_v1 = vld [vmem:[#allocation2 + $0x54] sm:$0xf0]  ;;  %v3970_v2 = vld [vmem:[#allocation2 + $0x4c] sm:$0xf]  ;;  %v2714_v4 = vor.u32 %v3971_v60, %v2713_v59  ;;  %v2718_v5 = vor.u32 %v3969_v61, %v2715_v63 }
  0x23   :  { %308 = vmatpush.bf16.msra.mxu1 %v2750_v45  ;;  %v2723_v3 = vld [vmem:[#allocation2 + $0x58] sm:$0xf0]  ;;  %v2722_v6 = vor.u32 %v3972_v1, %v2721_v0  ;;  %v2697_v7 = vld [vmem:[#allocation2 + $0x20] sm:$0xf]  ;;  %v3967_v8 = vld [vmem:[#allocation2 + $0x2c] sm:$0xf0] }
  0x24   :  { %321 = vmatpush.bf16.msra.mxu2 %v2754_v46  ;;  %334 = vmatpush.bf16.msra.mxu3 %v2758_v50  ;;  %v3965_v9 = vld [vmem:[#allocation2 + $0x24] sm:$0xf]  ;;  %v2726_v10 = vor.u32 %v3970_v2, %v2723_v3  ;;  %v2699_v11 = vld [vmem:[#allocation2 + $0x30] sm:$0xf0]  ;;  %v2705_v12 = vld [vmem:[#allocation2 + $0x28] sm:$0xf]  ;;  %v2698_v16 = vor.u32 %v3967_v8, %v2697_v7 }
  0x25   :  { %v3968_v13 = vld [vmem:[#allocation2 + $0x34] sm:$0xf0]  ;;  %v3966_v14 = vld [vmem:[#allocation2 + $0x2c] sm:$0xf]  ;;  %v2707_v15 = vld [vmem:[#allocation2 + $0x38] sm:$0xf0]  ;;  %v2702_v18 = vor.u32 %v3965_v9, %v2699_v11 }
  0x26   :  { %296 = vmatpush.bf16.msra.mxu0 %v2730_v56  ;;  %v2681_v17 = vld [vmem:[#allocation2] sm:$0xf]  ;;  %v2706_v19 = vor.u32 %v3968_v13, %v2705_v12  ;;  %v3963_v20 = vld [vmem:[#allocation2 + $0xc] sm:$0xf0]  ;;  %v3961_v21 = vld [vmem:[#allocation2 + $0x4] sm:$0xf]  ;;  %v2710_v23 = vor.u32 %v3966_v14, %v2707_v15 }
  0x27   :  { %309 = vmatpush.bf16.msra.mxu1 %v2734_v57  ;;  %v2683_v22 = vld [vmem:[#allocation2 + $0x10] sm:$0xf0]  ;;  %v2689_v24 = vld [vmem:[#allocation2 + $0x8] sm:$0xf]  ;;  %v3964_v25 = vld [vmem:[#allocation2 + $0x14] sm:$0xf0]  ;;  %v2682_v30 = vor.u32 %v3963_v20, %v2681_v17 }
  0x28   :  { %322 = vmatpush.bf16.msra.mxu2 %v2738_v58  ;;  %335 = vmatpush.bf16.msra.mxu3 %v2742_v62  ;;  %v3962_v26 = vld [vmem:[#allocation2 + $0xc] sm:$0xf]  ;;  %v2691_v27 = vld [vmem:[#allocation2 + $0x18] sm:$0xf0]  ;;  %v2922_v28 = vld [vmem:[#allocation4 + $0xe0] sm:$0xf]  ;;  %v2686_v33 = vor.u32 %v3961_v21, %v2683_v22  ;;  %v2690_v34 = vor.u32 %v3964_v25, %v2689_v24 }
  0x29   :  { %v4023_v29 = vld [vmem:[#allocation4 + $0xec] sm:$0xf0]  ;;  %v3050_v31 = vld [vmem:[#allocation4 + $0x1e0] sm:$0xf]  ;;  %v2694_v35 = vor.u32 %v3962_v26, %v2691_v27  ;;  %vm2670_vm0 = vcmask 64512  }
  0x2a   :  { %297 = vmatpush.bf16.msra.mxu0 %v2714_v4  ;;  %v4055_v32 = vld [vmem:[#allocation4 + $0x1ec] sm:$0xf0]  ;;  %v2923_v36 = vor.u32 %v4023_v29, %v2922_v28  ;;  %v2906_v37 = vld [vmem:[#allocation4 + $0xc0] sm:$0xf] }
  0x2b   :  { %310 = vmatpush.bf16.msra.mxu1 %v2718_v5  ;;  %v3178_v38 = vld [vmem:[#allocation4 + $0x2e0] sm:$0xf]  ;;  %v4087_v39 = vld [vmem:[#allocation4 + $0x2ec] sm:$0xf0]  ;;  %v3051_v40 = vor.u32 %v4055_v32, %v3050_v31 }
  0x2c   :  { %323 = vmatpush.bf16.msra.mxu2 %v2722_v6  ;;  %336 = vmatpush.bf16.msra.mxu3 %v2726_v10  ;;  %v4019_v41 = vld [vmem:[#allocation4 + $0xcc] sm:$0xf0]  ;;  %v3306_v42 = vld [vmem:[#allocation4 + $0x3e0] sm:$0xf]  ;;  %v3179_v47 = vor.u32 %v4087_v39, %v3178_v38 }
  0x2d   :  { %v4119_v43 = vld [vmem:[#allocation4 + $0x3ec] sm:$0xf0]  ;;  %v89_v44 = vld [vmem:[%s4547_s0] sm:$0xf]  ;;  %v2907_v48 = vor.u32 %v4019_v41, %v2906_v37 }
  0x2e   :  { %298 = vmatpush.bf16.msra.mxu0 %v2698_v16  ;;  %v3034_v45 = vld [vmem:[#allocation4 + $0x1c0] sm:$0xf]  ;;  %v4051_v46 = vld [vmem:[#allocation4 + $0x1cc] sm:$0xf0]  ;;  %v3307_v49 = vor.u32 %v4119_v43, %v3306_v42 }
  0x2f   :  { %311 = vmatpush.bf16.msra.mxu1 %v2702_v18  ;;  %v2890_v50 = vld [vmem:[#allocation4 + $0xa0] sm:$0xf]  ;;  %v4083_v52 = vld [vmem:[#allocation4 + $0x2cc] sm:$0xf0]  ;;  %v3035_v53 = vor.u32 %v4051_v46, %v3034_v45 }
  0x30   :  { %324 = vmatpush.bf16.msra.mxu2 %v2706_v19  ;;  %337 = vmatpush.bf16.msra.mxu3 %v2710_v23  ;;  %v3162_v51 = vld [vmem:[#allocation4 + $0x2c0] sm:$0xf]  ;;  %v4015_v54 = vld [vmem:[#allocation4 + $0xac] sm:$0xf0] }
  0x31   :  { %v3290_v55 = vld [vmem:[#allocation4 + $0x3c0] sm:$0xf]  ;;  %v4115_v56 = vld [vmem:[#allocation4 + $0x3cc] sm:$0xf0]  ;;  %v3163_v59 = vor.u32 %v4083_v52, %v3162_v51  ;;  %v2891_v60 = vor.u32 %v4015_v54, %v2890_v50 }
  0x32   :  { %299 = vmatpush.bf16.msra.mxu0 %v2682_v30  ;;  %v3018_v57 = vld [vmem:[#allocation4 + $0x1a0] sm:$0xf]  ;;  %v4047_v58 = vld [vmem:[#allocation4 + $0x1ac] sm:$0xf0]  ;;  %v3291_v61 = vor.u32 %v4115_v56, %v3290_v55  ;;  %v4021_v55 = vld [vmem:[#allocation4 + $0xe4] sm:$0xf] }
  0x33   :  { %312 = vmatpush.bf16.msra.mxu1 %v2686_v33  ;;  %v2874_v62 = vld [vmem:[#allocation4 + $0x80] sm:$0xf]  ;;  %v4079_v0 = vld [vmem:[#allocation4 + $0x2ac] sm:$0xf0]  ;;  %v3019_v1 = vor.u32 %v4047_v58, %v3018_v57  ;;  %v2924_v56 = vld [vmem:[#allocation4 + $0xf0] sm:$0xf0] }
  0x34   :  { %325 = vmatpush.bf16.msra.mxu2 %v2690_v34  ;;  %338 = vmatpush.bf16.msra.mxu3 %v2694_v35  ;;  %v3146_v63 = vld [vmem:[#allocation4 + $0x2a0] sm:$0xf]  ;;  %v4011_v2 = vld [vmem:[#allocation4 + $0x8c] sm:$0xf0]  ;;  %v4053_v57 = vld [vmem:[#allocation4 + $0x1e4] sm:$0xf] }
  0x35   :  { %300 = vmatmul.bf16.vlgmr.msra.gmra.mxu0 %v89_v44  ;;  %v3274_v3 = vld [vmem:[#allocation4 + $0x3a0] sm:$0xf]  ;;  %v4111_v4 = vld [vmem:[#allocation4 + $0x3ac] sm:$0xf0]  ;;  %v3147_v7 = vor.u32 %v4079_v0, %v3146_v63  ;;  %v2875_v8 = vor.u32 %v4011_v2, %v2874_v62  ;;  %v3052_v58 = vld [vmem:[#allocation4 + $0x1f0] sm:$0xf0] }
  0x36   :  { %1135 = vmatpush.bf16.msrb.mxu0 %v2923_v36  ;;  %313 = vmatmul.bf16.vlgmr.msra.gmra.mxu1 %v89_v44  ;;  %v3002_v5 = vld [vmem:[#allocation4 + $0x180] sm:$0xf]  ;;  %v4043_v6 = vld [vmem:[#allocation4 + $0x18c] sm:$0xf0]  ;;  %v3275_v9 = vor.u32 %v4111_v4, %v3274_v3  ;;  %v4017_v62 = vld [vmem:[#allocation4 + $0xc4] sm:$0xf]  ;;  %v2927_v3 = vor.u32 %v4021_v55, %v2924_v56 }
  0x37   :  { %1148 = vmatpush.bf16.msrb.mxu1 %v3051_v40  ;;  %326 = vmatmul.bf16.vlgmr.msra.gmra.mxu2 %v89_v44  ;;  %v2858_v10 = vld [vmem:[#allocation4 + $0x60] sm:$0xf]  ;;  %v4075_v12 = vld [vmem:[#allocation4 + $0x28c] sm:$0xf0]  ;;  %v3003_v13 = vor.u32 %v4043_v6, %v3002_v5  ;;  %v4085_v5 = vld [vmem:[#allocation4 + $0x2e4] sm:$0xf] }
  0x38   :  { %339 = vmatmul.bf16.vlgmr.msra.gmra.mxu3 %v89_v44  ;;  %1161 = vmatpush.bf16.msrb.mxu2 %v3179_v47  ;;  %v3130_v11 = vld [vmem:[#allocation4 + $0x280] sm:$0xf]  ;;  %v4007_v14 = vld [vmem:[#allocation4 + $0x6c] sm:$0xf0]  ;;  %v3180_v6 = vld [vmem:[#allocation4 + $0x2f0] sm:$0xf0] }
  0x39   :  { %1174 = vmatpush.bf16.msrb.mxu3 %v3307_v49  ;;  %v3258_v15 = vld [vmem:[#allocation4 + $0x380] sm:$0xf]  ;;  %v4107_v16 = vld [vmem:[#allocation4 + $0x38c] sm:$0xf0]  ;;  %v3131_v19 = vor.u32 %v4075_v12, %v3130_v11  ;;  %v2859_v20 = vor.u32 %v4007_v14, %v2858_v10  ;;  %v3308_v10 = vld [vmem:[#allocation4 + $0x3f0] sm:$0xf0] }
  0x3a   :  { %1136 = vmatpush.bf16.msrb.mxu0 %v2907_v48  ;;  %v2986_v17 = vld [vmem:[#allocation4 + $0x160] sm:$0xf]  ;;  %v4039_v18 = vld [vmem:[#allocation4 + $0x16c] sm:$0xf0]  ;;  %v3259_v21 = vor.u32 %v4107_v16, %v3258_v15  ;;  %v4049_v11 = vld [vmem:[#allocation4 + $0x1c4] sm:$0xf]  ;;  %v3183_v15 = vor.u32 %v4085_v5, %v3180_v6 }
  0x3b   :  { %1149 = vmatpush.bf16.msrb.mxu1 %v3035_v53  ;;  %v2842_v22 = vld [vmem:[#allocation4 + $0x40] sm:$0xf]  ;;  %v4071_v24 = vld [vmem:[#allocation4 + $0x26c] sm:$0xf0]  ;;  %v2987_v25 = vor.u32 %v4039_v18, %v2986_v17  ;;  %v3036_v12 = vld [vmem:[#allocation4 + $0x1d0] sm:$0xf0] }
  0x3c   :  { %1162 = vmatpush.bf16.msrb.mxu2 %v3163_v59  ;;  %v3114_v23 = vld [vmem:[#allocation4 + $0x260] sm:$0xf]  ;;  %v4003_v26 = vld [vmem:[#allocation4 + $0x4c] sm:$0xf0]  ;;  %v4013_v18 = vld [vmem:[#allocation4 + $0xa4] sm:$0xf] }
  0x3d   :  { %1175 = vmatpush.bf16.msrb.mxu3 %v3291_v61  ;;  %v3242_v27 = vld [vmem:[#allocation4 + $0x360] sm:$0xf]  ;;  %v4103_v28 = vld [vmem:[#allocation4 + $0x36c] sm:$0xf0]  ;;  %v3115_v31 = vor.u32 %v4071_v24, %v3114_v23  ;;  %v2843_v32 = vor.u32 %v4003_v26, %v2842_v22  ;;  %v2892_v22 = vld [vmem:[#allocation4 + $0xb0] sm:$0xf0] }
  0x3e   :  { %1137 = vmatpush.bf16.msrb.mxu0 %v2891_v60  ;;  %v2970_v29 = vld [vmem:[#allocation4 + $0x140] sm:$0xf]  ;;  %v4035_v30 = vld [vmem:[#allocation4 + $0x14c] sm:$0xf0]  ;;  %v3243_v33 = vor.u32 %v4103_v28, %v3242_v27  ;;  %v4113_v23 = vld [vmem:[#allocation4 + $0x3c4] sm:$0xf]  ;;  %v2895_v28 = vor.u32 %v4013_v18, %v2892_v22 }
  0x3f   :  { %1150 = vmatpush.bf16.msrb.mxu1 %v3019_v1  ;;  %v2826_v34 = vld [vmem:[#allocation4 + $0x20] sm:$0xf]  ;;  %v4067_v36 = vld [vmem:[#allocation4 + $0x24c] sm:$0xf0]  ;;  %v2971_v37 = vor.u32 %v4035_v30, %v2970_v29  ;;  %v3292_v24 = vld [vmem:[#allocation4 + $0x3d0] sm:$0xf0] }
  0x40   :  { %1163 = vmatpush.bf16.msrb.mxu2 %v3147_v7  ;;  %v3098_v35 = vld [vmem:[#allocation4 + $0x240] sm:$0xf]  ;;  %v3999_v38 = vld [vmem:[#allocation4 + $0x2c] sm:$0xf0]  ;;  %v3055_v7 = vor.u32 %v4053_v57, %v3052_v58  ;;  %v3020_v26 = vld [vmem:[#allocation4 + $0x1b0] sm:$0xf0]  ;;  %v3295_v29 = vor.u32 %v4113_v23, %v3292_v24 }
  0x41   :  { %1176 = vmatpush.bf16.msrb.mxu3 %v3275_v9  ;;  %v3226_v39 = vld [vmem:[#allocation4 + $0x340] sm:$0xf]  ;;  %v4099_v40 = vld [vmem:[#allocation4 + $0x34c] sm:$0xf0]  ;;  %v3099_v43 = vor.u32 %v4067_v36, %v3098_v35  ;;  %v2827_v46 = vor.u32 %v3999_v38, %v2826_v34  ;;  %v4117_v9 = vld [vmem:[#allocation4 + $0x3e4] sm:$0xf] }
  0x42   :  { %1138 = vmatpush.bf16.msrb.mxu0 %v2875_v8  ;;  %v2954_v41 = vld [vmem:[#allocation4 + $0x120] sm:$0xf]  ;;  %v4031_v42 = vld [vmem:[#allocation4 + $0x12c] sm:$0xf0]  ;;  %v3227_v47 = vor.u32 %v4099_v40, %v3226_v39  ;;  %v2908_v8 = vld [vmem:[#allocation4 + $0xd0] sm:$0xf0]  ;;  %v3311_v17 = vor.u32 %v4117_v9, %v3308_v10 }
  0x43   :  { %1151 = vmatpush.bf16.msrb.mxu1 %v3003_v13  ;;  %v2810_v44 = vld [vmem:[#allocation4] sm:$0xf]  ;;  %v3995_v45 = vld [vmem:[#allocation4 + $0xc] sm:$0xf0]  ;;  %v2955_v51 = vor.u32 %v4031_v42, %v2954_v41  ;;  %v2911_v16 = vor.u32 %v4017_v62, %v2908_v8  ;;  %v4009_v30 = vld [vmem:[#allocation4 + $0x84] sm:$0xf] }
  0x44   :  { %1164 = vmatpush.bf16.msrb.mxu2 %v3131_v19  ;;  %v2938_v48 = vld [vmem:[#allocation4 + $0x100] sm:$0xf]  ;;  %v4063_v50 = vld [vmem:[#allocation4 + $0x22c] sm:$0xf0]  ;;  %v2811_v60 = vor.u32 %v3995_v45, %v2810_v44  ;;  %v4081_v19 = vld [vmem:[#allocation4 + $0x2c4] sm:$0xf] }
  0x45   :  { %1177 = vmatpush.bf16.msrb.mxu3 %v3259_v21  ;;  %v3082_v49 = vld [vmem:[#allocation4 + $0x220] sm:$0xf]  ;;  %v4027_v52 = vld [vmem:[#allocation4 + $0x10c] sm:$0xf0]  ;;  %v3039_v21 = vor.u32 %v4049_v11, %v3036_v12  ;;  %v2876_v34 = vld [vmem:[#allocation4 + $0x90] sm:$0xf0] }
  0x46   :  { %1139 = vmatpush.bf16.msrb.mxu0 %v2859_v20  ;;  %v3210_v53 = vld [vmem:[#allocation4 + $0x320] sm:$0xf]  ;;  %v4095_v54 = vld [vmem:[#allocation4 + $0x32c] sm:$0xf0]  ;;  %v3083_v59 = vor.u32 %v4063_v50, %v3082_v49  ;;  %v2939_v2 = vor.u32 %v4027_v52, %v2938_v48  ;;  %v3164_v20 = vld [vmem:[#allocation4 + $0x2d0] sm:$0xf0]  ;;  %v2879_v40 = vor.u32 %v4009_v30, %v2876_v34 }
  0x47   :  { %1152 = vmatpush.bf16.msrb.mxu1 %v2987_v25  ;;  %v3211_v61 = vor.u32 %v4095_v54, %v3210_v53  ;;  %v3066_v63 = vld [vmem:[#allocation4 + $0x200] sm:$0xf]  ;;  %v4059_v0 = vld [vmem:[#allocation4 + $0x20c] sm:$0xf0]  ;;  %v4045_v25 = vld [vmem:[#allocation4 + $0x1a4] sm:$0xf]  ;;  %v3167_v27 = vor.u32 %v4081_v19, %v3164_v20 }
  0x48   :  { %1165 = vmatpush.bf16.msrb.mxu2 %v3115_v31  ;;  %v3194_v1 = vld [vmem:[#allocation4 + $0x300] sm:$0xf]  ;;  %v4091_v4 = vld [vmem:[#allocation4 + $0x30c] sm:$0xf0]  ;;  %v3067_v13 = vor.u32 %v4059_v0, %v3066_v63  ;;  %v4077_v31 = vld [vmem:[#allocation4 + $0x2a4] sm:$0xf] }
  0x49   :  { %1178 = vmatpush.bf16.msrb.mxu3 %v3243_v33  ;;  %v3195_v14 = vor.u32 %v4091_v4, %v3194_v1  ;;  %v3023_v33 = vor.u32 %v4045_v25, %v3020_v26  ;;  %v4109_v35 = vld [vmem:[#allocation4 + $0x3a4] sm:$0xf]  ;;  %v3276_v36 = vld [vmem:[#allocation4 + $0x3b0] sm:$0xf0] }
  0x4a   :  { %1140 = vmatpush.bf16.msrb.mxu0 %v2843_v32  ;;  %v3148_v32 = vld [vmem:[#allocation4 + $0x2b0] sm:$0xf0]  ;;  %v3279_v41 = vor.u32 %v4109_v35, %v3276_v36  ;;  %v4005_v42 = vld [vmem:[#allocation4 + $0x64] sm:$0xf] }
  0x4b   :  { %1153 = vmatpush.bf16.msrb.mxu1 %v2971_v37  ;;  %v4041_v37 = vld [vmem:[#allocation4 + $0x184] sm:$0xf]  ;;  %v3004_v38 = vld [vmem:[#allocation4 + $0x190] sm:$0xf0]  ;;  %v3151_v39 = vor.u32 %v4077_v31, %v3148_v32 }
  0x4c   :  { %1166 = vmatpush.bf16.msrb.mxu2 %v3099_v43  ;;  %v4073_v43 = vld [vmem:[#allocation4 + $0x284] sm:$0xf]  ;;  %v3132_v44 = vld [vmem:[#allocation4 + $0x290] sm:$0xf0]  ;;  %v3007_v45 = vor.u32 %v4041_v37, %v3004_v38 }
  0x4d   :  { %1179 = vmatpush.bf16.msrb.mxu3 %v3227_v47  ;;  %v4105_v47 = vld [vmem:[#allocation4 + $0x384] sm:$0xf]  ;;  %v3260_v48 = vld [vmem:[#allocation4 + $0x390] sm:$0xf0] }
  0x4e   :  { %1141 = vmatpush.bf16.msrb.mxu0 %v2827_v46  ;;  %v2860_v46 = vld [vmem:[#allocation4 + $0x70] sm:$0xf0]  ;;  %v4037_v49 = vld [vmem:[#allocation4 + $0x164] sm:$0xf]  ;;  %v3263_v53 = vor.u32 %v4105_v47, %v3260_v48 }
  0x4f   :  { %1154 = vmatpush.bf16.msrb.mxu1 %v2955_v51  ;;  %v2988_v50 = vld [vmem:[#allocation4 + $0x170] sm:$0xf0]  ;;  %v3135_v51 = vor.u32 %v4073_v43, %v3132_v44  ;;  %v2863_v52 = vor.u32 %v4005_v42, %v2860_v46  ;;  %v4001_v55 = vld [vmem:[#allocation4 + $0x44] sm:$0xf]  ;;  %v2930_v42 = vld [vmem:[#allocation4 + $0xe8] sm:$0xf] }
  0x50   :  { %1167 = vmatpush.bf16.msrb.mxu2 %v3083_v59  ;;  %v2991_v54 = vor.u32 %v4037_v49, %v2988_v50  ;;  %v2844_v56 = vld [vmem:[#allocation4 + $0x50] sm:$0xf0]  ;;  %v4033_v57 = vld [vmem:[#allocation4 + $0x144] sm:$0xf]  ;;  %v4024_v43 = vld [vmem:[#allocation4 + $0xf4] sm:$0xf0] }
  0x51   :  { %1180 = vmatpush.bf16.msrb.mxu3 %v3211_v61  ;;  %v2847_v58 = vor.u32 %v4001_v55, %v2844_v56  ;;  %v2972_v59 = vld [vmem:[#allocation4 + $0x150] sm:$0xf0]  ;;  %v4069_v61 = vld [vmem:[#allocation4 + $0x264] sm:$0xf]  ;;  %v4056_v46 = vld [vmem:[#allocation4 + $0x1f4] sm:$0xf0]  ;;  %v2931_v50 = vor.u32 %v4024_v43, %v2930_v42 }
  0x52   :  { %1142 = vmatpush.bf16.msrb.mxu0 %v2811_v60  ;;  %v2975_v60 = vor.u32 %v4033_v57, %v2972_v59  ;;  %v3116_v62 = vld [vmem:[#allocation4 + $0x270] sm:$0xf0]  ;;  %v4101_v0 = vld [vmem:[#allocation4 + $0x364] sm:$0xf]  ;;  %v4020_v55 = vld [vmem:[#allocation4 + $0xd4] sm:$0xf0] }
  0x53   :  { %1155 = vmatpush.bf16.msrb.mxu1 %v2939_v2  ;;  %v3119_v63 = vor.u32 %v4069_v61, %v3116_v62  ;;  %v3244_v1 = vld [vmem:[#allocation4 + $0x370] sm:$0xf0]  ;;  %v4029_v5 = vld [vmem:[#allocation4 + $0x124] sm:$0xf]  ;;  %v4052_v61 = vld [vmem:[#allocation4 + $0x1d4] sm:$0xf0] }
  0x54   :  { %1168 = vmatpush.bf16.msrb.mxu2 %v3067_v13  ;;  %v3247_v2 = vor.u32 %v4101_v0, %v3244_v1  ;;  %v2828_v4 = vld [vmem:[#allocation4 + $0x30] sm:$0xf0]  ;;  %v4065_v9 = vld [vmem:[#allocation4 + $0x244] sm:$0xf]  ;;  %v3186_v0 = vld [vmem:[#allocation4 + $0x2e8] sm:$0xf] }
  0x55   :  { %1181 = vmatpush.bf16.msrb.mxu3 %v3195_v14  ;;  %v3100_v10 = vld [vmem:[#allocation4 + $0x250] sm:$0xf0]  ;;  %v4097_v11 = vld [vmem:[#allocation4 + $0x344] sm:$0xf]  ;;  %v4088_v1 = vld [vmem:[#allocation4 + $0x2f4] sm:$0xf0] }
  0x56   :  { %1187 = vmatpush.bf16.msra.mxu0 %v2927_v3  ;;  %v3997_v3 = vld [vmem:[#allocation4 + $0x24] sm:$0xf]  ;;  %v3103_v12 = vor.u32 %v4065_v9, %v3100_v10  ;;  %v3228_v13 = vld [vmem:[#allocation4 + $0x350] sm:$0xf0]  ;;  %v4016_v9 = vld [vmem:[#allocation4 + $0xb4] sm:$0xf0] }
  0x57   :  { %1200 = vmatpush.bf16.msra.mxu1 %v3055_v7  ;;  %v2831_v6 = vor.u32 %v3997_v3, %v2828_v4  ;;  %v2956_v7 = vld [vmem:[#allocation4 + $0x130] sm:$0xf0]  ;;  %v3231_v14 = vor.u32 %v4097_v11, %v3228_v13  ;;  %v4025_v18 = vld [vmem:[#allocation4 + $0x104] sm:$0xf]  ;;  %v3314_v4 = vld [vmem:[#allocation4 + $0x3e8] sm:$0xf] }
  0x58   :  { %1213 = vmatpush.bf16.msra.mxu2 %v3183_v15  ;;  %v2959_v8 = vor.u32 %v4029_v5, %v2956_v7  ;;  %v3993_v15 = vld [vmem:[#allocation4 + $0x4] sm:$0xf]  ;;  %v2940_v19 = vld [vmem:[#allocation4 + $0x110] sm:$0xf0]  ;;  %v4120_v5 = vld [vmem:[#allocation4 + $0x3f4] sm:$0xf0] }
  0x59   :  { %1226 = vmatpush.bf16.msra.mxu3 %v3311_v17  ;;  %v2943_v20 = vor.u32 %v4025_v18, %v2940_v19  ;;  %v3084_v22 = vld [vmem:[#allocation4 + $0x230] sm:$0xf0]  ;;  %v4093_v23 = vld [vmem:[#allocation4 + $0x324] sm:$0xf]  ;;  %v3026_v11 = vld [vmem:[#allocation4 + $0x1a8] sm:$0xf] }
  0x5a   :  { %1188 = vmatpush.bf16.msra.mxu0 %v2911_v16  ;;  %v2812_v16 = vld [vmem:[#allocation4 + $0x10] sm:$0xf0]  ;;  %v4089_v30 = vld [vmem:[#allocation4 + $0x304] sm:$0xf]  ;;  %v3170_v18 = vld [vmem:[#allocation4 + $0x2c8] sm:$0xf] }
  0x5b   :  { %1201 = vmatpush.bf16.msra.mxu1 %v3039_v21  ;;  %v2815_v17 = vor.u32 %v3993_v15, %v2812_v16  ;;  %v4061_v21 = vld [vmem:[#allocation4 + $0x224] sm:$0xf]  ;;  %v3212_v25 = vld [vmem:[#allocation4 + $0x330] sm:$0xf0]  ;;  %v3315_v16 = vor.u32 %v4120_v5, %v3314_v4  ;;  %v4084_v19 = vld [vmem:[#allocation4 + $0x2d4] sm:$0xf0] }
  0x5c   :  { %1214 = vmatpush.bf16.msra.mxu2 %v3167_v27  ;;  %v3087_v24 = vor.u32 %v4061_v21, %v3084_v22  ;;  %v3215_v26 = vor.u32 %v4093_v23, %v3212_v25  ;;  %v4057_v27 = vld [vmem:[#allocation4 + $0x204] sm:$0xf]  ;;  %v3196_v31 = vld [vmem:[#allocation4 + $0x310] sm:$0xf0]  ;;  %v2882_v25 = vld [vmem:[#allocation4 + $0x88] sm:$0xf] }
  0x5d   :  { %1227 = vmatpush.bf16.msra.mxu3 %v3295_v29  ;;  %v3199_v32 = vor.u32 %v4089_v30, %v3196_v31  ;;  %v3171_v30 = vor.u32 %v4084_v19, %v3170_v18  ;;  %v2932_v19 = vld [vmem:[#allocation4 + $0xf8] sm:$0xf0] }
  0x5e   :  { %1189 = vmatpush.bf16.msra.mxu0 %v2895_v28  ;;  %v3068_v28 = vld [vmem:[#allocation4 + $0x210] sm:$0xf0] }
  0x5f   :  { %1202 = vmatpush.bf16.msra.mxu1 %v3023_v33  ;;  %v3071_v29 = vor.u32 %v4057_v27, %v3068_v28  ;;  %v122_v33 = vld [vmem:[%s4549_s2] ss:$4 sm:$0xf] }
  0x60   :  { %1215 = vmatpush.bf16.msra.mxu2 %v3151_v39  ;;  %v124_v34 = vperm.slane %v122_v33, 0  ;;  %v125_v35 = vperm.slane %v122_v33, 1  ;;  %v127_v48 = vperm.slane %v122_v33, 3  ;;  %v3010_v28 = vld [vmem:[#allocation4 + $0x188] sm:$0xf] }
  0x61   :  { %1228 = vmatpush.bf16.msra.mxu3 %v3279_v41 }
  0x62   :  { %1190 = vmatpush.bf16.msra.mxu0 %v2879_v40  ;;  %v126_v40 = vperm.slane %v122_v33, 2  ;;  %v3154_v33 = vld [vmem:[#allocation4 + $0x2a8] sm:$0xf] }
  0x63   :  { %1203 = vmatpush.bf16.msra.mxu1 %v3007_v45  ;;  %v3058_v45 = vld [vmem:[#allocation4 + $0x1e8] sm:$0xf] }
  0x64   :  { %1216 = vmatpush.bf16.msra.mxu2 %v3135_v51 }
  0x65   :  { %1229 = vmatpush.bf16.msra.mxu3 %v3263_v53  ;;  %v3059_v53 = vor.u32 %v4056_v46, %v3058_v45  ;;  %v4076_v45 = vld [vmem:[#allocation4 + $0x294] sm:$0xf0] }
  0x66   :  { %1191 = vmatpush.bf16.msra.mxu0 %v2863_v52 }
  0x67   :  { %1204 = vmatpush.bf16.msra.mxu1 %v2991_v54  ;;  %v2914_v54 = vld [vmem:[#allocation4 + $0xc8] sm:$0xf] }
  0x68   :  { %1217 = vmatpush.bf16.msra.mxu2 %v3119_v63  ;;  %v2915_v3 = vor.u32 %v4020_v55, %v2914_v54  ;;  %v4036_v54 = vld [vmem:[#allocation4 + $0x154] sm:$0xf0] }
  0x69   :  { %1230 = vmatpush.bf16.msra.mxu3 %v3247_v2 }
  0x6a   :  { %1192 = vmatpush.bf16.msra.mxu0 %v2847_v58 }
  0x6b   :  { %1205 = vmatpush.bf16.msra.mxu1 %v2975_v60  ;;  %v3042_v60 = vld [vmem:[#allocation4 + $0x1c8] sm:$0xf] }
  0x6c   :  { %1218 = vmatpush.bf16.msra.mxu2 %v3103_v12  ;;  %v3043_v7 = vor.u32 %v4052_v61, %v3042_v60  ;;  %v4048_v12 = vld [vmem:[#allocation4 + $0x1b4] sm:$0xf0] }
  0x6d   :  { %1231 = vmatpush.bf16.msra.mxu3 %v3231_v14  ;;  %v3187_v14 = vor.u32 %v4088_v1, %v3186_v0  ;;  %v3027_v23 = vor.u32 %v4048_v12, %v3026_v11  ;;  %v2834_v0 = vld [vmem:[#allocation4 + $0x28] sm:$0xf]  ;;  %v4000_v1 = vld [vmem:[#allocation4 + $0x34] sm:$0xf0] }
  0x6e   :  { %1193 = vmatpush.bf16.msra.mxu0 %v2831_v6  ;;  %v4100_v11 = vld [vmem:[#allocation4 + $0x354] sm:$0xf0]  ;;  %v2818_v12 = vld [vmem:[#allocation4 + $0x8] sm:$0xf] }
  0x6f   :  { %1206 = vmatpush.bf16.msra.mxu1 %v2959_v8  ;;  %v2898_v8 = vld [vmem:[#allocation4 + $0xa8] sm:$0xf] }
  0x70   :  { %1219 = vmatpush.bf16.msra.mxu2 %v3087_v24  ;;  %v4116_v24 = vld [vmem:[#allocation4 + $0x3d4] sm:$0xf0] }
  0x71   :  { %1232 = vmatpush.bf16.msra.mxu3 %v3215_v26  ;;  %v4012_v26 = vld [vmem:[#allocation4 + $0x94] sm:$0xf0] }
  0x72   :  { %1194 = vmatpush.bf16.msra.mxu0 %v2815_v17  ;;  %v2899_v17 = vor.u32 %v4016_v9, %v2898_v8  ;;  %v3234_v8 = vld [vmem:[#allocation4 + $0x348] sm:$0xf]  ;;  %v2835_v9 = vor.u32 %v4000_v1, %v2834_v0  ;;  %v4010_v0 = vld [vmem:[#allocation4 + $0x8c] sm:$0xf]  ;;  %v2884_v1 = vld [vmem:[#allocation4 + $0x98] sm:$0xf0] }
  0x73   :  { %1207 = vmatpush.bf16.msra.mxu1 %v2943_v20  ;;  %v3298_v20 = vld [vmem:[#allocation4 + $0x3c8] sm:$0xf] }
  0x74   :  { %1220 = vmatpush.bf16.msra.mxu2 %v3071_v29  ;;  %v4044_v29 = vld [vmem:[#allocation4 + $0x194] sm:$0xf0]  ;;  %v3299_v31 = vor.u32 %v4116_v24, %v3298_v20  ;;  %v4054_v20 = vld [vmem:[#allocation4 + $0x1ec] sm:$0xf]  ;;  %v3090_v24 = vld [vmem:[#allocation4 + $0x228] sm:$0xf] }
  0x75   :  { %1233 = vmatpush.bf16.msra.mxu3 %v3199_v32  ;;  %v2883_v32 = vor.u32 %v4012_v26, %v2882_v25  ;;  %v4064_v25 = vld [vmem:[#allocation4 + $0x234] sm:$0xf0] }
  0xb2   :  { %v301_v36 = vpop.f32.mrf.mxu0 }
  0xb3   :  { %v302_v37 = vadd.f32 %v301_v36, %v124_v34  ;;  %v314_v38 = vpop.f32.mrf.mxu1  ;;  %v4080_v34 = vld [vmem:[#allocation4 + $0x2b4] sm:$0xf0]  ;;  %v3282_v36 = vld [vmem:[#allocation4 + $0x3a8] sm:$0xf] }
  0xb4   :  { %v315_v39 = vadd.f32 %v314_v38, %v125_v35  ;;  %v3011_v35 = vor.u32 %v4044_v29, %v3010_v28  ;;  %v2866_v38 = vld [vmem:[#allocation4 + $0x68] sm:$0xf]  ;;  %v3155_v42 = vor.u32 %v4080_v34, %v3154_v33  ;;  %v4096_v29 = vld [vmem:[#allocation4 + $0x334] sm:$0xf0]  ;;  %v3091_v33 = vor.u32 %v4064_v25, %v3090_v24  ;;  %v2916_v34 = vld [vmem:[#allocation4 + $0xd8] sm:$0xf0] }
  0xb5   :  { %v344_v41 = vmul.f32 0.2, %v302_v37  ;;  %v3218_v28 = vld [vmem:[#allocation4 + $0x328] sm:$0xf]  ;;  %v4106_v24 = vld [vmem:[#allocation4 + $0x38c] sm:$0xf] }
  0xb6   :  { %v345_v44 = vmul.f32 0.2, %v315_v39  ;;  %v3268_v25 = vld [vmem:[#allocation4 + $0x398] sm:$0xf0] }
  0xb7   :  { %v348_v47 = vmax.f32 %v302_v37, %v344_v41  ;;  %v4112_v37 = vld [vmem:[#allocation4 + $0x3b4] sm:$0xf0] }
  0xb8   :  { %v349_v49 = vmax.f32 %v315_v39, %v345_v44  ;;  %v4008_v39 = vld [vmem:[#allocation4 + $0x74] sm:$0xf0]  ;;  %v3283_v43 = vor.u32 %v4112_v37, %v3282_v36  ;;  %v3138_v44 = vld [vmem:[#allocation4 + $0x288] sm:$0xf]  ;;  %v3044_v36 = vld [vmem:[#allocation4 + $0x1d8] sm:$0xf0]  ;;  %v3219_v37 = vor.u32 %v4096_v29, %v3218_v28 }
  0xb9   :  { %v4460_v51 = vpack.c.bf16 %v348_v47, %v348_v47  ;;  %v4040_v41 = vld [vmem:[#allocation4 + $0x174] sm:$0xf0]  ;;  %v2867_v46 = vor.u32 %v4008_v39, %v2866_v38  ;;  %v3139_v55 = vor.u32 %v4076_v45, %v3138_v44  ;;  %v3074_v38 = vld [vmem:[#allocation4 + $0x208] sm:$0xf]  ;;  %v4034_v28 = vld [vmem:[#allocation4 + $0x14c] sm:$0xf] }
  0xba   :  { %v327_v52 = vpop.f32.mrf.mxu2  ;;  %v4462_v56 = vpack.c.bf16 %v349_v49, %v349_v49  ;;  %v303_v59 = vpop.f32.mrf.mxu0  ;;  %v4108_v49 = vld [vmem:[#allocation4 + $0x394] sm:$0xf0]  ;;  %v2980_v29 = vld [vmem:[#allocation4 + $0x158] sm:$0xf0] }
  0xbb   :  { %v328_v57 = vadd.f32 %v327_v52, %v126_v40  ;;  %v340_v58 = vpop.f32.mrf.mxu3  ;;  %1143 = vmatmul.bf16.vlgmr.msrb.gmra.mxu0 %v4460_v51  ;;  %v316_v63 = vpop.f32.mrf.mxu1  ;;  %v2994_v40 = vld [vmem:[#allocation4 + $0x168] sm:$0xf]  ;;  %v4004_v52 = vld [vmem:[#allocation4 + $0x54] sm:$0xf0] }
  0xbc   :  { %v341_v62 = vadd.f32 %v340_v58, %v127_v48  ;;  %1156 = vmatmul.bf16.vlgmr.msrb.gmra.mxu1 %v4462_v56  ;;  %1239 = vmatpush.bf16.msrb.mxu0 %v2931_v50  ;;  %v2995_v47 = vor.u32 %v4040_v41, %v2994_v40  ;;  %v3266_v48 = vld [vmem:[#allocation4 + $0x388] sm:$0xf]  ;;  %v4072_v59 = vld [vmem:[#allocation4 + $0x274] sm:$0xf0] }
  0xbd   :  { %v346_v2 = vmul.f32 0.2, %v328_v57  ;;  %1252 = vmatpush.bf16.msrb.mxu1 %v3059_v53  ;;  %v2850_v50 = vld [vmem:[#allocation4 + $0x48] sm:$0xf]  ;;  %v4104_v63 = vld [vmem:[#allocation4 + $0x374] sm:$0xf0] }
  0xbe   :  { %v347_v6 = vmul.f32 0.2, %v341_v62  ;;  %v2978_v53 = vld [vmem:[#allocation4 + $0x148] sm:$0xf]  ;;  %v2851_v60 = vor.u32 %v4004_v52, %v2850_v50  ;;  %v4060_v39 = vld [vmem:[#allocation4 + $0x214] sm:$0xf0] }
  0xbf   :  { %v350_v10 = vmax.f32 %v328_v57, %v346_v2  ;;  %v3267_v57 = vor.u32 %v4108_v49, %v3266_v48  ;;  %v3122_v58 = vld [vmem:[#allocation4 + $0x268] sm:$0xf]  ;;  %v2979_v61 = vor.u32 %v4036_v54, %v2978_v53  ;;  %v4092_v41 = vld [vmem:[#allocation4 + $0x314] sm:$0xf0]  ;;  %v4014_v48 = vld [vmem:[#allocation4 + $0xac] sm:$0xf]  ;;  %v3075_v49 = vor.u32 %v4060_v39, %v3074_v38 }
  0xc0   :  { %v351_v13 = vmax.f32 %v341_v62, %v347_v6  ;;  %1240 = vmatpush.bf16.msrb.mxu0 %v2915_v3  ;;  %v3250_v62 = vld [vmem:[#allocation4 + $0x368] sm:$0xf]  ;;  %v4032_v3 = vld [vmem:[#allocation4 + $0x134] sm:$0xf0]  ;;  %v3123_v4 = vor.u32 %v4072_v59, %v3122_v58  ;;  %v2900_v50 = vld [vmem:[#allocation4 + $0xb8] sm:$0xf0] }
  0xc1   :  { %v4466_v15 = vpack.c.bf16 %v350_v10, %v350_v10  ;;  %1253 = vmatpush.bf16.msrb.mxu1 %v3043_v7  ;;  %v2962_v2 = vld [vmem:[#allocation4 + $0x128] sm:$0xf]  ;;  %v3251_v5 = vor.u32 %v4104_v63, %v3250_v62  ;;  %v4068_v7 = vld [vmem:[#allocation4 + $0x254] sm:$0xf0]  ;;  %v4046_v52 = vld [vmem:[#allocation4 + $0x1ac] sm:$0xf] }
  0xc2   :  { %v4468_v21 = vpack.c.bf16 %v351_v13, %v351_v13  ;;  %v329_v22 = vpop.f32.mrf.mxu2  ;;  %v3106_v6 = vld [vmem:[#allocation4 + $0x248] sm:$0xf]  ;;  %v2963_v10 = vor.u32 %v4032_v3, %v2962_v2  ;;  %v3996_v13 = vld [vmem:[#allocation4 + $0x14] sm:$0xf0]  ;;  %v3028_v53 = vld [vmem:[#allocation4 + $0x1b8] sm:$0xf0] }
  0xc3   :  { %v342_v27 = vpop.f32.mrf.mxu3  ;;  %1169 = vmatmul.bf16.vlgmr.msrb.gmra.mxu2 %v4466_v15  ;;  %v3107_v18 = vor.u32 %v4068_v7, %v3106_v6  ;;  %v3060_v22 = vld [vmem:[#allocation4 + $0x1f8] sm:$0xf0]  ;;  %v2819_v26 = vor.u32 %v3996_v13, %v2818_v12  ;;  %v3202_v40 = vld [vmem:[#allocation4 + $0x308] sm:$0xf]  ;;  %v4082_v58 = vld [vmem:[#allocation4 + $0x2cc] sm:$0xf] }
  0xc4   :  { %1182 = vmatmul.bf16.vlgmr.msrb.gmra.mxu3 %v4468_v21  ;;  %1265 = vmatpush.bf16.msrb.mxu2 %v3187_v14  ;;  %v2946_v14 = vld [vmem:[#allocation4 + $0x108] sm:$0xf]  ;;  %v3203_v54 = vor.u32 %v4092_v41, %v3202_v40  ;;  %v3172_v59 = vld [vmem:[#allocation4 + $0x2d8] sm:$0xf0]  ;;  %v4114_v62 = vld [vmem:[#allocation4 + $0x3cc] sm:$0xf] }
  0xc5   :  { %1278 = vmatpush.bf16.msrb.mxu3 %v3315_v16  ;;  %1241 = vmatpush.bf16.msrb.mxu0 %v2899_v17  ;;  %v4028_v16 = vld [vmem:[#allocation4 + $0x114] sm:$0xf0]  ;;  %v4022_v17 = vld [vmem:[#allocation4 + $0xec] sm:$0xf]  ;;  %v3300_v63 = vld [vmem:[#allocation4 + $0x3d8] sm:$0xf0] }
  0xc6   :  { %1254 = vmatpush.bf16.msrb.mxu1 %v3027_v23  ;;  %v3235_v23 = vor.u32 %v4100_v11, %v3234_v8  ;;  %v2947_v27 = vor.u32 %v4028_v16, %v2946_v14  ;;  %v4042_v2 = vld [vmem:[#allocation4 + $0x18c] sm:$0xf]  ;;  %v3012_v3 = vld [vmem:[#allocation4 + $0x198] sm:$0xf0]  ;;  %v2887_v8 = vor.u32 %v4010_v0, %v2884_v1 }
  0xc7   :  { %v4078_v6 = vld [vmem:[#allocation4 + $0x2ac] sm:$0xf]  ;;  %v3156_v7 = vld [vmem:[#allocation4 + $0x2b8] sm:$0xf0] }
  0xc8   :  { %1266 = vmatpush.bf16.msrb.mxu2 %v3171_v30  ;;  %v2935_v30 = vor.u32 %v4022_v17, %v2932_v19  ;;  %v3284_v11 = vld [vmem:[#allocation4 + $0x3b8] sm:$0xf0]  ;;  %v4006_v12 = vld [vmem:[#allocation4 + $0x6c] sm:$0xf]  ;;  %v3159_v17 = vor.u32 %v4078_v6, %v3156_v7 }
  0xc9   :  { %1279 = vmatpush.bf16.msrb.mxu3 %v3299_v31  ;;  %1242 = vmatpush.bf16.msrb.mxu0 %v2883_v32  ;;  %v3063_v31 = vor.u32 %v4054_v20, %v3060_v22  ;;  %v4018_v32 = vld [vmem:[#allocation4 + $0xcc] sm:$0xf]  ;;  %v2868_v13 = vld [vmem:[#allocation4 + $0x78] sm:$0xf0] }
  0xca   :  { %1255 = vmatpush.bf16.msrb.mxu1 %v3011_v35  ;;  %v4050_v35 = vld [vmem:[#allocation4 + $0x1cc] sm:$0xf]  ;;  %v2919_v44 = vor.u32 %v4018_v32, %v2916_v34  ;;  %v2996_v16 = vld [vmem:[#allocation4 + $0x178] sm:$0xf0]  ;;  %v2871_v22 = vor.u32 %v4006_v12, %v2868_v13 }
  0xcb   :  { %1195 = vmatmul.bf16.vlgmr.msra.gmra.mxu0 %v4460_v51  ;;  %v3047_v45 = vor.u32 %v4050_v35, %v3044_v36  ;;  %v4038_v14 = vld [vmem:[#allocation4 + $0x16c] sm:$0xf]  ;;  %v3140_v20 = vld [vmem:[#allocation4 + $0x298] sm:$0xf0]  ;;  %v2983_v35 = vor.u32 %v4034_v28, %v2980_v29 }
  0xcc   :  { %1267 = vmatpush.bf16.msrb.mxu2 %v3155_v42  ;;  %1208 = vmatmul.bf16.vlgmr.msra.gmra.mxu1 %v4462_v56  ;;  %v4086_v42 = vld [vmem:[#allocation4 + $0x2ec] sm:$0xf]  ;;  %v2836_v39 = vld [vmem:[#allocation4 + $0x38] sm:$0xf0] }
  0xcd   :  { %1280 = vmatpush.bf16.msrb.mxu3 %v3283_v43  ;;  %1243 = vmatpush.bf16.msrb.mxu0 %v2867_v46  ;;  %v3188_v43 = vld [vmem:[#allocation4 + $0x2f8] sm:$0xf0]  ;;  %v4118_v46 = vld [vmem:[#allocation4 + $0x3ec] sm:$0xf] }
  0xce   :  { %1256 = vmatpush.bf16.msrb.mxu1 %v2995_v47  ;;  %v3316_v47 = vld [vmem:[#allocation4 + $0x3f8] sm:$0xf0]  ;;  %v4074_v19 = vld [vmem:[#allocation4 + $0x28c] sm:$0xf] }
  0xcf   :  { %v4070_v32 = vld [vmem:[#allocation4 + $0x26c] sm:$0xf]  ;;  %v2964_v41 = vld [vmem:[#allocation4 + $0x138] sm:$0xf0] }
  0xd0   :  { %1268 = vmatpush.bf16.msrb.mxu2 %v3139_v55  ;;  %v3191_v55 = vor.u32 %v4086_v42, %v3188_v43  ;;  %v4102_v36 = vld [vmem:[#allocation4 + $0x36c] sm:$0xf]  ;;  %v3076_v13 = vld [vmem:[#allocation4 + $0x218] sm:$0xf0] }
  0xd1   :  { %1281 = vmatpush.bf16.msrb.mxu3 %v3267_v57  ;;  %1244 = vmatpush.bf16.msrb.mxu0 %v2851_v60  ;;  %v3319_v57 = vor.u32 %v4118_v46, %v3316_v47  ;;  %v2903_v60 = vor.u32 %v4014_v48, %v2900_v50  ;;  %v3998_v38 = vld [vmem:[#allocation4 + $0x2c] sm:$0xf] }
  0xd2   :  { %1257 = vmatpush.bf16.msrb.mxu1 %v2979_v61  ;;  %v3031_v61 = vor.u32 %v4046_v52, %v3028_v53  ;;  %v4030_v40 = vld [vmem:[#allocation4 + $0x12c] sm:$0xf]  ;;  %v2839_v47 = vor.u32 %v3998_v38, %v2836_v39  ;;  %v2820_v52 = vld [vmem:[#allocation4 + $0x18] sm:$0xf0]  ;;  %v4167_v38 = vld [vmem:[#allocation6 + $0x16c] sm:$0xf0] }
  0xd3   :  { %1221 = vmatmul.bf16.vlgmr.msra.gmra.mxu2 %v4466_v15  ;;  %v4098_v46 = vld [vmem:[#allocation4 + $0x34c] sm:$0xf]  ;;  %v2967_v48 = vor.u32 %v4030_v40, %v2964_v41  ;;  %v3355_v40 = vld [vmem:[#allocation6 + $0x40] sm:$0xf]  ;;  %v4131_v41 = vld [vmem:[#allocation6 + $0x4c] sm:$0xf0] }
  0xd4   :  { %1234 = vmatmul.bf16.vlgmr.msra.gmra.mxu3 %v4468_v21  ;;  %1269 = vmatpush.bf16.msrb.mxu2 %v3123_v4  ;;  %v3175_v4 = vor.u32 %v4082_v58, %v3172_v59  ;;  %v3994_v50 = vld [vmem:[#allocation4 + $0xc] sm:$0xf]  ;;  %v4151_v58 = vld [vmem:[#allocation6 + $0xec] sm:$0xf0]  ;;  %v3563_v59 = vld [vmem:[#allocation6 + $0x1e0] sm:$0xf] }
  0xd5   :  { %1282 = vmatpush.bf16.msrb.mxu3 %v3251_v5  ;;  %1245 = vmatpush.bf16.msrb.mxu0 %v2835_v9  ;;  %v3303_v5 = vor.u32 %v4114_v62, %v3300_v63  ;;  %v3015_v9 = vor.u32 %v4042_v2, %v3012_v3  ;;  %v4026_v53 = vld [vmem:[#allocation4 + $0x10c] sm:$0xf]  ;;  %v3092_v63 = vld [vmem:[#allocation4 + $0x238] sm:$0xf0]  ;;  %v2823_v0 = vor.u32 %v3994_v50, %v2820_v52  ;;  %v4145_v52 = vld [vmem:[#allocation6 + $0xc4] sm:$0xf] }
  0xd6   :  { %1258 = vmatpush.bf16.msrb.mxu1 %v2963_v10  ;;  %v4110_v10 = vld [vmem:[#allocation4 + $0x3ac] sm:$0xf]  ;;  %v3220_v3 = vld [vmem:[#allocation4 + $0x338] sm:$0xf0] }
  0xd7   :  { %v4062_v62 = vld [vmem:[#allocation4 + $0x22c] sm:$0xf] }
  0xd8   :  { %1270 = vmatpush.bf16.msrb.mxu2 %v3107_v18  ;;  %v3287_v18 = vor.u32 %v4110_v10, %v3284_v11  ;;  %v4094_v2 = vld [vmem:[#allocation4 + $0x32c] sm:$0xf]  ;;  %v3095_v7 = vor.u32 %v4062_v62, %v3092_v63  ;;  %v4179_v10 = vld [vmem:[#allocation6 + $0x1cc] sm:$0xf0]  ;;  %v3405_v62 = vld [vmem:[#allocation6 + $0xb0] sm:$0xf0] }
  0xd9   :  { %1283 = vmatpush.bf16.msrb.mxu3 %v3235_v23  ;;  %1246 = vmatpush.bf16.msrb.mxu0 %v2819_v26  ;;  %v2999_v23 = vor.u32 %v4038_v14, %v2996_v16  ;;  %v4002_v26 = vld [vmem:[#allocation4 + $0x4c] sm:$0xf]  ;;  %v3223_v11 = vor.u32 %v4094_v2, %v3220_v3  ;;  %v3204_v16 = vld [vmem:[#allocation4 + $0x318] sm:$0xf0]  ;;  %v4159_v2 = vld [vmem:[#allocation6 + $0x12c] sm:$0xf0] }
  0xda   :  { %1259 = vmatpush.bf16.msrb.mxu1 %v2947_v27  ;;  %v2852_v27 = vld [vmem:[#allocation4 + $0x58] sm:$0xf0]  ;;  %v4058_v12 = vld [vmem:[#allocation4 + $0x20c] sm:$0xf]  ;;  %v3659_v3 = vld [vmem:[#allocation6 + $0x2a0] sm:$0xf] }
  0xdb   :  { %v2855_v34 = vor.u32 %v4002_v26, %v2852_v27  ;;  %v4090_v14 = vld [vmem:[#allocation4 + $0x30c] sm:$0xf]  ;;  %v3531_v26 = vld [vmem:[#allocation6 + $0x1a0] sm:$0xf]  ;;  %v4175_v27 = vld [vmem:[#allocation6 + $0x1ac] sm:$0xf0] }
  0xdc   :  { %1271 = vmatpush.bf16.msrb.mxu2 %v3091_v33  ;;  %1247 = vmatmul.bf16.vlgmr.msrb.gmra.mxu0 %v4460_v51  ;;  %v3124_v33 = vld [vmem:[#allocation4 + $0x278] sm:$0xf0] }
  0xdd   :  { %1291 = vmatpush.bf16.msra.mxu0 %v2935_v30  ;;  %1284 = vmatpush.bf16.msrb.mxu3 %v3219_v37  ;;  %v3143_v30 = vor.u32 %v4074_v19, %v3140_v20  ;;  %v3252_v37 = vld [vmem:[#allocation4 + $0x378] sm:$0xf0]  ;;  %v3127_v42 = vor.u32 %v4070_v32, %v3124_v33  ;;  %v3532_v32 = vor.u32 %v4175_v27, %v3531_v26  ;;  %v3515_v33 = vld [vmem:[#allocation6 + $0x180] sm:$0xf]  ;;  %v4129_v27 = vld [vmem:[#allocation6 + $0x44] sm:$0xf] }
  0xde   :  { %1304 = vmatpush.bf16.msra.mxu1 %v3063_v31  ;;  %v3271_v31 = vor.u32 %v4106_v24, %v3268_v25  ;;  %v3255_v43 = vor.u32 %v4102_v36, %v3252_v37  ;;  %v4143_v24 = vld [vmem:[#allocation6 + $0xac] sm:$0xf0]  ;;  %v3207_v25 = vor.u32 %v4090_v14, %v3204_v16  ;;  %v3499_v37 = vld [vmem:[#allocation6 + $0x160] sm:$0xf]  ;;  %v4133_v16 = vld [vmem:[#allocation6 + $0x64] sm:$0xf] }
  0xdf   :  { %1260 = vmatmul.bf16.vlgmr.msrb.gmra.mxu1 %v4462_v56  ;;  %v4135_v36 = vld [vmem:[#allocation6 + $0x6c] sm:$0xf0] }
  0xe0   :  { %1272 = vmatpush.bf16.msrb.mxu2 %v3075_v49  ;;  %v3236_v49 = vld [vmem:[#allocation4 + $0x358] sm:$0xf0]  ;;  %v4203_v14 = vld [vmem:[#allocation6 + $0x28c] sm:$0xf0] }
  0xe1   :  { %1292 = vmatpush.bf16.msra.mxu0 %v2919_v44  ;;  %1285 = vmatpush.bf16.msrb.mxu3 %v3203_v54  ;;  %v4066_v44 = vld [vmem:[#allocation4 + $0x24c] sm:$0xf]  ;;  %v2948_v54 = vld [vmem:[#allocation4 + $0x118] sm:$0xf0] }
  0xe2   :  { %1305 = vmatpush.bf16.msra.mxu1 %v3047_v45  ;;  %v3108_v45 = vld [vmem:[#allocation4 + $0x258] sm:$0xf0]  ;;  %v2951_v1 = vor.u32 %v4026_v53, %v2948_v54  ;;  %v3421_v53 = vld [vmem:[#allocation6 + $0xd0] sm:$0xf0] }
  0xe3   :  { %1273 = vmatmul.bf16.vlgmr.msrb.gmra.mxu2 %v4466_v15  ;;  %v3424_v54 = vor.u32 %v4145_v52, %v3421_v53  ;;  %v4247_v52 = vld [vmem:[#allocation6 + $0x3ec] sm:$0xf0]  ;;  %v4165_v53 = vld [vmem:[#allocation6 + $0x164] sm:$0xf] }
  0xe4   :  { %1317 = vmatpush.bf16.msra.mxu2 %v3191_v55  ;;  %1286 = vmatmul.bf16.vlgmr.msrb.gmra.mxu3 %v4468_v21  ;;  %v3435_v55 = vld [vmem:[#allocation6 + $0xe0] sm:$0xf] }
  0xe5   :  { %1330 = vmatpush.bf16.msra.mxu3 %v3319_v57  ;;  %1293 = vmatpush.bf16.msra.mxu0 %v2903_v60  ;;  %v3111_v57 = vor.u32 %v4066_v44, %v3108_v45  ;;  %v4183_v60 = vld [vmem:[#allocation6 + $0x1ec] sm:$0xf0]  ;;  %v3339_v44 = vld [vmem:[#allocation6 + $0x20] sm:$0xf] }
  0xe6   :  { %1306 = vmatpush.bf16.msra.mxu1 %v3031_v61  ;;  %v3239_v61 = vor.u32 %v4098_v46, %v3236_v49  ;;  %v3564_v6 = vor.u32 %v4183_v60, %v3563_v59  ;;  %v4123_v46 = vld [vmem:[#allocation6 + $0xc] sm:$0xf0] }
  0xe7   :  { %v4211_v60 = vld [vmem:[#allocation6 + $0x2cc] sm:$0xf0] }
  0xe8   :  { %1318 = vmatpush.bf16.msra.mxu2 %v3175_v4  ;;  %v3436_v4 = vor.u32 %v4151_v58, %v3435_v55  ;;  %v3483_v55 = vld [vmem:[#allocation6 + $0x140] sm:$0xf] }
  0xe9   :  { %1331 = vmatpush.bf16.msra.mxu3 %v3303_v5  ;;  %1294 = vmatpush.bf16.msra.mxu0 %v2887_v8  ;;  %v3419_v5 = vld [vmem:[#allocation6 + $0xc0] sm:$0xf]  ;;  %v4147_v8 = vld [vmem:[#allocation6 + $0xcc] sm:$0xf0] }
  0xea   :  { %1307 = vmatpush.bf16.msra.mxu1 %v3015_v9  ;;  %v3547_v9 = vld [vmem:[#allocation6 + $0x1c0] sm:$0xf]  ;;  %v3420_v19 = vor.u32 %v4147_v8, %v3419_v5  ;;  %v4207_v5 = vld [vmem:[#allocation6 + $0x2ac] sm:$0xf0] }
  0xeb   :  { %v3548_v20 = vor.u32 %v4179_v10, %v3547_v9  ;;  %v3675_v58 = vld [vmem:[#allocation6 + $0x2c0] sm:$0xf]  ;;  %v3660_v8 = vor.u32 %v4207_v5, %v3659_v3 }
  0xec   :  { %1319 = vmatpush.bf16.msra.mxu2 %v3159_v17  ;;  %v3691_v17 = vld [vmem:[#allocation6 + $0x2e0] sm:$0xf]  ;;  %v3676_v63 = vor.u32 %v4211_v60, %v3675_v58  ;;  %v4213_v58 = vld [vmem:[#allocation6 + $0x2e4] sm:$0xf] }
  0xed   :  { %1332 = vmatpush.bf16.msra.mxu3 %v3287_v18  ;;  %1295 = vmatpush.bf16.msra.mxu0 %v2871_v22  ;;  %v4215_v18 = vld [vmem:[#allocation6 + $0x2ec] sm:$0xf0]  ;;  %v3079_v22 = vor.u32 %v4058_v12, %v3076_v13  ;;  %v3451_v10 = vld [vmem:[#allocation6 + $0x100] sm:$0xf] }
  0xee   :  { %1308 = vmatpush.bf16.msra.mxu1 %v2999_v23  ;;  %v3403_v23 = vld [vmem:[#allocation6 + $0xa0] sm:$0xf]  ;;  %v3692_v28 = vor.u32 %v4215_v18, %v3691_v17  ;;  %v3373_v17 = vld [vmem:[#allocation6 + $0x70] sm:$0xf0] }
  0xef   :  { %v3404_v29 = vor.u32 %v4143_v24, %v3403_v23  ;;  %v3643_v12 = vld [vmem:[#allocation6 + $0x280] sm:$0xf] }
  0xf0   :  { %1320 = vmatpush.bf16.msra.mxu2 %v3143_v30  ;;  %v3387_v30 = vld [vmem:[#allocation6 + $0x80] sm:$0xf]  ;;  %v3644_v18 = vor.u32 %v4203_v14, %v3643_v12  ;;  %v4157_v12 = vld [vmem:[#allocation6 + $0x124] sm:$0xf] }
  0xf1   :  { %1333 = vmatpush.bf16.msra.mxu3 %v3271_v31  ;;  %1296 = vmatpush.bf16.msra.mxu0 %v2855_v34  ;;  %v4139_v31 = vld [vmem:[#allocation6 + $0x8c] sm:$0xf0]  ;;  %v3627_v24 = vld [vmem:[#allocation6 + $0x260] sm:$0xf] }
  0xf2   :  { %1309 = vmatpush.bf16.msra.mxu1 %v2983_v35  ;;  %v4171_v34 = vld [vmem:[#allocation6 + $0x18c] sm:$0xf0]  ;;  %v3371_v35 = vld [vmem:[#allocation6 + $0x60] sm:$0xf] }
  0xf3   :  { %v3372_v39 = vor.u32 %v4135_v36, %v3371_v35  ;;  %v4125_v35 = vld [vmem:[#allocation6 + $0x24] sm:$0xf]  ;;  %v3341_v36 = vld [vmem:[#allocation6 + $0x30] sm:$0xf0] }
  0xf4   :  { %1321 = vmatpush.bf16.msra.mxu2 %v3127_v42  ;;  %v3500_v42 = vor.u32 %v4167_v38, %v3499_v37  ;;  %v4173_v37 = vld [vmem:[#allocation6 + $0x1a4] sm:$0xf]  ;;  %v3533_v38 = vld [vmem:[#allocation6 + $0x1b0] sm:$0xf0] }
  0xf5   :  { %1334 = vmatpush.bf16.msra.mxu3 %v3255_v43  ;;  %1297 = vmatpush.bf16.msra.mxu0 %v2839_v47  ;;  %v3356_v43 = vor.u32 %v4131_v41, %v3355_v40  ;;  %v4149_v47 = vld [vmem:[#allocation6 + $0xe4] sm:$0xf]  ;;  %v3595_v40 = vld [vmem:[#allocation6 + $0x220] sm:$0xf]  ;;  %v4191_v41 = vld [vmem:[#allocation6 + $0x22c] sm:$0xf0] }
  0xf6   :  { %1310 = vmatpush.bf16.msra.mxu1 %v2967_v48  ;;  %v3437_v48 = vld [vmem:[#allocation6 + $0xf0] sm:$0xf0]  ;;  %v4487_v5 = vld [vmem:[%s4549_s2 + $0x1] ss:$4 sm:$0xf] }
  0xf7   :  { %v3440_v50 = vor.u32 %v4149_v47, %v3437_v48  ;;  %v3579_v47 = vld [vmem:[#allocation6 + $0x200] sm:$0xf]  ;;  %v4187_v48 = vld [vmem:[#allocation6 + $0x20c] sm:$0xf0] }
  0xf8   :  { %1322 = vmatpush.bf16.msra.mxu2 %v3111_v57  ;;  %v4163_v57 = vld [vmem:[#allocation6 + $0x14c] sm:$0xf0] }
  0xf9   :  { %1335 = vmatpush.bf16.msra.mxu3 %v3239_v61  ;;  %1298 = vmatpush.bf16.msra.mxu0 %v2823_v0  ;;  %v3484_v59 = vor.u32 %v4163_v57, %v3483_v55  ;;  %v4141_v61 = vld [vmem:[#allocation6 + $0xa4] sm:$0xf] }
  0xfa   :  { %1311 = vmatpush.bf16.msra.mxu1 %v2951_v1  ;;  %v3408_v0 = vor.u32 %v4141_v61, %v3405_v62  ;;  %v3467_v1 = vld [vmem:[#allocation6 + $0x120] sm:$0xf]  ;;  %v4243_v62 = vld [vmem:[#allocation6 + $0x3cc] sm:$0xf0] }
  0xfb   :  { %v3803_v61 = vld [vmem:[#allocation6 + $0x3c0] sm:$0xf] }
  0xfc   :  { %1323 = vmatpush.bf16.msra.mxu2 %v3095_v7  ;;  %1299 = vmatmul.bf16.vlgmr.msra.gmra.mxu0 %v4460_v51  ;;  %v3388_v51 = vor.u32 %v4139_v31, %v3387_v30  ;;  %v3389_v7 = vld [vmem:[#allocation6 + $0x90] sm:$0xf0] }
  0xfd   :  { %2134 = vmatpush.bf16.msrb.mxu0 %v3436_v4  ;;  %1336 = vmatpush.bf16.msra.mxu3 %v3223_v11  ;;  %v3468_v4 = vor.u32 %v4159_v2, %v3467_v1  ;;  %v4155_v11 = vld [vmem:[#allocation6 + $0x10c] sm:$0xf0]  ;;  %v3549_v31 = vld [vmem:[#allocation6 + $0x1d0] sm:$0xf0]  ;;  %v4209_v2 = vld [vmem:[#allocation6 + $0x2c4] sm:$0xf] }
  0xfe   :  { %2147 = vmatpush.bf16.msrb.mxu1 %v3564_v6  ;;  %v4137_v6 = vld [vmem:[#allocation6 + $0x84] sm:$0xf]  ;;  %v3452_v13 = vor.u32 %v4155_v11, %v3451_v10  ;;  %v3485_v1 = vld [vmem:[#allocation6 + $0x150] sm:$0xf0]  ;;  %v4239_v10 = vld [vmem:[#allocation6 + $0x3ac] sm:$0xf0] }
  0xff   :  { %1312 = vmatmul.bf16.vlgmr.msra.gmra.mxu1 %v4462_v56  ;;  %v3516_v56 = vor.u32 %v4171_v34, %v3515_v33  ;;  %v3392_v9 = vor.u32 %v4137_v6, %v3389_v7  ;;  %v3611_v33 = vld [vmem:[#allocation6 + $0x240] sm:$0xf]  ;;  %v4195_v34 = vld [vmem:[#allocation6 + $0x24c] sm:$0xf0] }
 0x100   :  { %1324 = vmatpush.bf16.msra.mxu2 %v3079_v22  ;;  %v3565_v22 = vld [vmem:[#allocation6 + $0x1f0] sm:$0xf0] }
 0x101   :  { %2135 = vmatpush.bf16.msrb.mxu0 %v3420_v19  ;;  %1337 = vmatpush.bf16.msra.mxu3 %v3207_v25  ;;  %v3376_v19 = vor.u32 %v4133_v16, %v3373_v17  ;;  %v4199_v25 = vld [vmem:[#allocation6 + $0x26c] sm:$0xf0]  ;;  %v4205_v16 = vld [vmem:[#allocation6 + $0x2a4] sm:$0xf]  ;;  %v3661_v17 = vld [vmem:[#allocation6 + $0x2b0] sm:$0xf0] }
 0x102   :  { %2148 = vmatpush.bf16.msrb.mxu1 %v3548_v20  ;;  %v4181_v20 = vld [vmem:[#allocation6 + $0x1e4] sm:$0xf]  ;;  %v3628_v26 = vor.u32 %v4199_v25, %v3627_v24  ;;  %v3453_v25 = vld [vmem:[#allocation6 + $0x110] sm:$0xf0] }
 0x103   :  { %1325 = vmatmul.bf16.vlgmr.msra.gmra.mxu2 %v4466_v15  ;;  %v4127_v15 = vld [vmem:[#allocation6 + $0x2c] sm:$0xf0]  ;;  %v3568_v23 = vor.u32 %v4181_v20, %v3565_v22  ;;  %v3771_v20 = vld [vmem:[#allocation6 + $0x380] sm:$0xf]  ;;  %v4153_v24 = vld [vmem:[#allocation6 + $0x104] sm:$0xf] }
 0x104   :  { %2160 = vmatpush.bf16.msrb.mxu2 %v3692_v28  ;;  %1338 = vmatmul.bf16.vlgmr.msra.gmra.mxu3 %v4468_v21  ;;  %v3340_v45 = vor.u32 %v4127_v15, %v3339_v44  ;;  %v3323_v21 = vld [vmem:[#allocation6] sm:$0xf]  ;;  %v3357_v28 = vld [vmem:[#allocation6 + $0x50] sm:$0xf0]  ;;  %v4169_v15 = vld [vmem:[#allocation6 + $0x184] sm:$0xf] }
 0x105   :  { %2136 = vmatpush.bf16.msrb.mxu0 %v3404_v29  ;;  %v3324_v49 = vor.u32 %v4123_v46, %v3323_v21  ;;  %v4177_v29 = vld [vmem:[#allocation6 + $0x1c4] sm:$0xf]  ;;  %v3360_v30 = vor.u32 %v4129_v27, %v3357_v28  ;;  %v3325_v44 = vld [vmem:[#allocation6 + $0x10] sm:$0xf0]  ;;  %v4235_v22 = vld [vmem:[#allocation6 + $0x38c] sm:$0xf0]  ;;  %v3456_v27 = vor.u32 %v4153_v24, %v3453_v25 }
 0x106   :  { %2149 = vmatpush.bf16.msrb.mxu1 %v3532_v32  ;;  %v3552_v32 = vor.u32 %v4177_v29, %v3549_v31  ;;  %v3517_v21 = vld [vmem:[#allocation6 + $0x190] sm:$0xf0] }
 0x107   :  { %v3520_v46 = vor.u32 %v4169_v15, %v3517_v21  ;;  %v3645_v28 = vld [vmem:[#allocation6 + $0x290] sm:$0xf0] }
 0x108   :  { %2161 = vmatpush.bf16.msrb.mxu2 %v3676_v63  ;;  %v3804_v63 = vor.u32 %v4243_v62, %v3803_v61  ;;  %v3613_v15 = vld [vmem:[#allocation6 + $0x250] sm:$0xf0]  ;;  %v3427_v61 = vld [vmem:[#allocation6 + $0xc8] sm:$0xf] }
 0x109   :  { %2137 = vmatpush.bf16.msrb.mxu0 %v3388_v51  ;;  %v3612_v51 = vor.u32 %v4195_v34, %v3611_v33  ;;  %v3755_v33 = vld [vmem:[#allocation6 + $0x360] sm:$0xf]  ;;  %v4231_v34 = vld [vmem:[#allocation6 + $0x36c] sm:$0xf0] }
 0x10a   :  { %2150 = vmatpush.bf16.msrb.mxu1 %v3516_v56  ;;  %v3344_v56 = vor.u32 %v4125_v35, %v3341_v36  ;;  %v4197_v35 = vld [vmem:[#allocation6 + $0x264] sm:$0xf]  ;;  %v3629_v36 = vld [vmem:[#allocation6 + $0x270] sm:$0xf0] }
 0x10c   :  { %2162 = vmatpush.bf16.msrb.mxu2 %v3660_v8 }
 0x10d   :  { %2138 = vmatpush.bf16.msrb.mxu0 %v3372_v39  ;;  %v3536_v39 = vor.u32 %v4173_v37, %v3533_v38 }
 0x10e   :  { %2151 = vmatpush.bf16.msrb.mxu1 %v3500_v42  ;;  %v3596_v42 = vor.u32 %v4191_v41, %v3595_v40  ;;  %v4227_v40 = vld [vmem:[#allocation6 + $0x34c] sm:$0xf0] }
 0x110   :  { %2163 = vmatpush.bf16.msrb.mxu2 %v3644_v18  ;;  %v487_v18 = vperm.slane %v4487_v5, 0 }
 0x111   :  { %2139 = vmatpush.bf16.msrb.mxu0 %v3356_v43  ;;  %v4121_v43 = vld [vmem:[#allocation6 + $0x4] sm:$0xf] }
 0x112   :  { %2152 = vmatpush.bf16.msrb.mxu1 %v3484_v59  ;;  %v3693_v59 = vld [vmem:[#allocation6 + $0x2f0] sm:$0xf0] }
 0x113   :  { %v3696_v60 = vor.u32 %v4213_v58, %v3693_v59 }
 0x114   :  { %2164 = vmatpush.bf16.msrb.mxu2 %v3628_v26  ;;  %v4201_v26 = vld [vmem:[#allocation6 + $0x284] sm:$0xf] }
 0x115   :  { %2140 = vmatpush.bf16.msrb.mxu0 %v3340_v45  ;;  %v3328_v45 = vor.u32 %v4121_v43, %v3325_v44  ;;  %v3648_v31 = vor.u32 %v4201_v26, %v3645_v28  ;;  %v4193_v44 = vld [vmem:[#allocation6 + $0x244] sm:$0xf] }
 0x116   :  { %2153 = vmatpush.bf16.msrb.mxu1 %v3468_v4  ;;  %v3677_v4 = vld [vmem:[#allocation6 + $0x2d0] sm:$0xf0] }
 0x117   :  { %v3680_v7 = vor.u32 %v4209_v2, %v3677_v4  ;;  %v4219_v2 = vld [vmem:[#allocation6 + $0x30c] sm:$0xf0] }
 0x118   :  { %2165 = vmatpush.bf16.msrb.mxu2 %v3612_v51  ;;  %v3756_v51 = vor.u32 %v4231_v34, %v3755_v33 }
 0x119   :  { %2141 = vmatpush.bf16.msrb.mxu0 %v3324_v49  ;;  %v3819_v49 = vld [vmem:[#allocation6 + $0x3e0] sm:$0xf] }
 0x11a   :  { %2154 = vmatpush.bf16.msrb.mxu1 %v3452_v13  ;;  %v3820_v55 = vor.u32 %v4247_v52, %v3819_v49  ;;  %v3469_v13 = vld [vmem:[#allocation6 + $0x130] sm:$0xf0]  ;;  %v4152_v49 = vld [vmem:[#allocation6 + $0xf4] sm:$0xf0]  ;;  %v4223_v52 = vld [vmem:[#allocation6 + $0x32c] sm:$0xf0] }
 0x11b   :  { %v3472_v14 = vor.u32 %v4157_v12, %v3469_v13 }
 0x11c   :  { %2166 = vmatpush.bf16.msrb.mxu2 %v3596_v42  ;;  %2173 = vmatpush.bf16.msrb.mxu3 %v3820_v55  ;;  %v4189_v55 = vld [vmem:[#allocation6 + $0x224] sm:$0xf] }
 0x11d   :  { %2186 = vmatpush.bf16.msra.mxu0 %v3440_v50  ;;  %v3580_v50 = vor.u32 %v4187_v48, %v3579_v47  ;;  %v3443_v47 = vld [vmem:[#allocation6 + $0xe8] sm:$0xf] }
 0x11e   :  { %2199 = vmatpush.bf16.msra.mxu1 %v3568_v23  ;;  %v3772_v23 = vor.u32 %v4235_v22, %v3771_v20  ;;  %v4241_v20 = vld [vmem:[#allocation6 + $0x3c4] sm:$0xf]  ;;  %v3805_v22 = vld [vmem:[#allocation6 + $0x3d0] sm:$0xf0] }
 0x120   :  { %2167 = vmatpush.bf16.msrb.mxu2 %v3580_v50  ;;  %2174 = vmatpush.bf16.msrb.mxu3 %v3804_v63  ;;  %v3723_v50 = vld [vmem:[#allocation6 + $0x320] sm:$0xf]  ;;  %v3444_v63 = vor.u32 %v4152_v49, %v3443_v47  ;;  %v3363_v47 = vld [vmem:[#allocation6 + $0x48] sm:$0xf] }
 0x121   :  { %2187 = vmatpush.bf16.msra.mxu0 %v3424_v54  ;;  %v3501_v54 = vld [vmem:[#allocation6 + $0x170] sm:$0xf0]  ;;  %v3555_v49 = vld [vmem:[#allocation6 + $0x1c8] sm:$0xf] }
 0x122   :  { %2200 = vmatpush.bf16.msra.mxu1 %v3552_v32  ;;  %v3504_v57 = vor.u32 %v4165_v53, %v3501_v54  ;;  %v3724_v54 = vor.u32 %v4223_v52, %v3723_v50 }
 0x124   :  { %2212 = vmatpush.bf16.msra.mxu2 %v3696_v60  ;;  %v488_v60 = vperm.slane %v4487_v5, 1 }
 0x125   :  { %2188 = vmatpush.bf16.msra.mxu0 %v3408_v0  ;;  %v4161_v0 = vld [vmem:[#allocation6 + $0x144] sm:$0xf] }
 0x126   :  { %2201 = vmatpush.bf16.msra.mxu1 %v3536_v39  ;;  %v3488_v3 = vor.u32 %v4161_v0, %v3485_v1  ;;  %v3739_v39 = vld [vmem:[#allocation6 + $0x340] sm:$0xf]  ;;  %v4148_v0 = vld [vmem:[#allocation6 + $0xd4] sm:$0xf0] }
 0x127   :  { %v3740_v43 = vor.u32 %v4227_v40, %v3739_v39  ;;  %v3707_v1 = vld [vmem:[#allocation6 + $0x300] sm:$0xf] }
 0x128   :  { %2213 = vmatpush.bf16.msra.mxu2 %v3680_v7  ;;  %v4185_v7 = vld [vmem:[#allocation6 + $0x204] sm:$0xf] }
 0x129   :  { %2189 = vmatpush.bf16.msra.mxu0 %v3392_v9  ;;  %v3787_v9 = vld [vmem:[#allocation6 + $0x3a0] sm:$0xf] }
 0x12a   :  { %2202 = vmatpush.bf16.msra.mxu1 %v3520_v46  ;;  %v3788_v11 = vor.u32 %v4239_v10, %v3787_v9  ;;  %v4245_v9 = vld [vmem:[#allocation6 + $0x3e4] sm:$0xf] }
 0x12c   :  { %2175 = vmatpush.bf16.msrb.mxu3 %v3788_v11  ;;  %v3821_v11 = vld [vmem:[#allocation6 + $0x3f0] sm:$0xf0] }
 0x12d   :  { %2190 = vmatpush.bf16.msra.mxu0 %v3376_v19  ;;  %v3664_v19 = vor.u32 %v4205_v16, %v3661_v17  ;;  %v3428_v17 = vor.u32 %v4148_v0, %v3427_v61  ;;  %v3539_v0 = vld [vmem:[#allocation6 + $0x1a8] sm:$0xf] }
 0x12e   :  { %2203 = vmatpush.bf16.msra.mxu1 %v3504_v57  ;;  %v3597_v57 = vld [vmem:[#allocation6 + $0x230] sm:$0xf0] }
 0x12f   :  { %2214 = vmatpush.bf16.msra.mxu2 %v3664_v19  ;;  %v3600_v58 = vor.u32 %v4189_v55, %v3597_v57  ;;  %v4144_v19 = vld [vmem:[#allocation6 + $0xb4] sm:$0xf0]  ;;  %v3757_v55 = vld [vmem:[#allocation6 + $0x370] sm:$0xf0] }
 0x130   :  { %2176 = vmatpush.bf16.msrb.mxu3 %v3772_v23  ;;  %v3808_v23 = vor.u32 %v4241_v20, %v3805_v22  ;;  %v4150_v22 = vld [vmem:[#allocation6 + $0xec] sm:$0xf] }
 0x131   :  { %2191 = vmatpush.bf16.msra.mxu0 %v3360_v30 }
 0x132   :  { %2204 = vmatpush.bf16.msra.mxu1 %v3488_v3 }
 0x133   :  { %2215 = vmatpush.bf16.msra.mxu2 %v3648_v31  ;;  %v4237_v31 = vld [vmem:[#allocation6 + $0x3a4] sm:$0xf] }
 0x134   :  { %2177 = vmatpush.bf16.msrb.mxu3 %v3756_v51  ;;  %v3379_v51 = vld [vmem:[#allocation6 + $0x68] sm:$0xf] }
 0x135   :  { %2192 = vmatpush.bf16.msra.mxu0 %v3344_v56  ;;  %v3632_v56 = vor.u32 %v4197_v35, %v3629_v36 }
 0x136   :  { %2205 = vmatpush.bf16.msra.mxu1 %v3472_v14  ;;  %v3824_v14 = vor.u32 %v4245_v9, %v3821_v11  ;;  %v3331_v11 = vld [vmem:[#allocation6 + $0x8] sm:$0xf] }
 0x137   :  { %2216 = vmatpush.bf16.msra.mxu2 %v3632_v56  ;;  %v4136_v56 = vld [vmem:[#allocation6 + $0x74] sm:$0xf0] }
 0x138   :  { %v1144_v6 = vpop.f32.mrf.mxu0  ;;  %2178 = vmatpush.bf16.msrb.mxu3 %v3740_v43 }
 0x139   :  { %2193 = vmatpush.bf16.msra.mxu0 %v3328_v45  ;;  %v1157_v8 = vpop.f32.mrf.mxu1  ;;  %v1145_v29 = vadd.f32 %v1144_v6, %v487_v18  ;;  %v3616_v45 = vor.u32 %v4193_v44, %v3613_v15  ;;  %v3708_v6 = vor.u32 %v4219_v2, %v3707_v1  ;;  %v3411_v18 = vld [vmem:[#allocation6 + $0xa8] sm:$0xf]  ;;  %v489_v15 = vperm.slane %v4487_v5, 2  ;;  %v4176_v2 = vld [vmem:[#allocation6 + $0x1b4] sm:$0xf0] }
 0x13a   :  { %2206 = vmatpush.bf16.msra.mxu1 %v3456_v27  ;;  %v3412_v26 = vor.u32 %v4144_v19, %v3411_v18  ;;  %v3395_v27 = vld [vmem:[#allocation6 + $0x88] sm:$0xf]  ;;  %v4221_v18 = vld [vmem:[#allocation6 + $0x324] sm:$0xf]  ;;  %v3725_v19 = vld [vmem:[#allocation6 + $0x330] sm:$0xf0] }
 0x13b   :  { %v1158_v37 = vadd.f32 %v1157_v8, %v1145_v29  ;;  %2217 = vmatpush.bf16.msra.mxu2 %v3616_v45  ;;  %v3581_v8 = vld [vmem:[#allocation6 + $0x210] sm:$0xf0] }
 0x13c   :  { %2179 = vmatpush.bf16.msrb.mxu3 %v3724_v54  ;;  %v3584_v10 = vor.u32 %v4185_v7, %v3581_v8  ;;  %v4229_v54 = vld [vmem:[#allocation6 + $0x364] sm:$0xf] }
 0x13d   :  { %v3760_v57 = vor.u32 %v4229_v54, %v3757_v55  ;;  %v4160_v54 = vld [vmem:[#allocation6 + $0x134] sm:$0xf0]  ;;  %v3667_v55 = vld [vmem:[#allocation6 + $0x2a8] sm:$0xf] }
 0x13f   :  { %2218 = vmatpush.bf16.msra.mxu2 %v3600_v58 }
 0x140   :  { %v1146_v30 = vpop.f32.mrf.mxu0  ;;  %2180 = vmatpush.bf16.msrb.mxu3 %v3708_v6  ;;  %v3741_v6 = vld [vmem:[#allocation6 + $0x350] sm:$0xf0] }
 0x141   :  { %v1159_v32 = vpop.f32.mrf.mxu1  ;;  %v4140_v30 = vld [vmem:[#allocation6 + $0x94] sm:$0xf0] }
 0x142   :  { %v3789_v32 = vld [vmem:[#allocation6 + $0x3b0] sm:$0xf0]  ;;  %v3396_v36 = vor.u32 %v4140_v30, %v3395_v27  ;;  %v3699_v30 = vld [vmem:[#allocation6 + $0x2e8] sm:$0xf] }
 0x143   :  { %2219 = vmatpush.bf16.msra.mxu2 %v3584_v10  ;;  %v3792_v33 = vor.u32 %v4237_v31, %v3789_v32  ;;  %v3540_v10 = vor.u32 %v4176_v2, %v3539_v0  ;;  %v4216_v32 = vld [vmem:[#allocation6 + $0x2f4] sm:$0xf0]  ;;  %v3459_v0 = vld [vmem:[#allocation6 + $0x108] sm:$0xf] }
 0x144   :  { %2225 = vmatpush.bf16.msra.mxu3 %v3824_v14  ;;  %v3651_v2 = vld [vmem:[#allocation6 + $0x288] sm:$0xf] }
 0x146   :  { %v1170_v38 = vpop.f32.mrf.mxu2 }
 0x147   :  { %v1171_v41 = vadd.f32 %v1170_v38, %v1158_v37  ;;  %v1183_v42 = vpop.f32.mrf.mxu3  ;;  %v3571_v37 = vld [vmem:[#allocation6 + $0x1e8] sm:$0xf]  ;;  %v4184_v38 = vld [vmem:[#allocation6 + $0x1f4] sm:$0xf0] }
 0x148   :  { %v1196_v46 = vpop.f32.mrf.mxu0  ;;  %2226 = vmatpush.bf16.msra.mxu3 %v3808_v23  ;;  %v3445_v23 = vld [vmem:[#allocation6 + $0xf8] sm:$0xf0] }
 0x149   :  { %v1184_v21 = vadd.f32 %v1183_v42, %v1171_v41  ;;  %v1209_v48 = vpop.f32.mrf.mxu1  ;;  %v1197_v12 = vadd.f32 %v1196_v46, %v488_v60  ;;  %v4233_v41 = vld [vmem:[#allocation6 + $0x384] sm:$0xf]  ;;  %v3773_v42 = vld [vmem:[#allocation6 + $0x390] sm:$0xf0]  ;;  %v3572_v46 = vor.u32 %v4184_v38, %v3571_v37  ;;  %v3448_v31 = vor.u32 %v4150_v22, %v3445_v23  ;;  %v4178_v22 = vld [vmem:[#allocation6 + $0x1cc] sm:$0xf] }
 0x14a   :  { %v3776_v43 = vor.u32 %v4233_v41, %v3773_v42  ;;  %v3700_v41 = vor.u32 %v4216_v32, %v3699_v30  ;;  %v3557_v23 = vld [vmem:[#allocation6 + $0x1d8] sm:$0xf0]  ;;  %v4196_v30 = vld [vmem:[#allocation6 + $0x254] sm:$0xf0] }
 0x14b   :  { %v1343_v53 = vmul.f32 0.2, %v1184_v21  ;;  %v1210_v24 = vadd.f32 %v1209_v48, %v1197_v12  ;;  %v4132_v48 = vld [vmem:[#allocation6 + $0x54] sm:$0xf0]  ;;  %v3349_v32 = vld [vmem:[#allocation6 + $0x38] sm:$0xf0] }
 0x14c   :  { %2227 = vmatpush.bf16.msra.mxu3 %v3792_v33  ;;  %v3364_v60 = vor.u32 %v4132_v48, %v3363_v47  ;;  %v4124_v12 = vld [vmem:[#allocation6 + $0x14] sm:$0xf0]  ;;  %v4217_v33 = vld [vmem:[#allocation6 + $0x304] sm:$0xf]  ;;  %v3413_v47 = vld [vmem:[#allocation6 + $0xb8] sm:$0xf0] }
 0x14d   :  { %v1347_v59 = vmax.f32 %v1184_v21, %v1343_v53  ;;  %v3380_v21 = vor.u32 %v4136_v56, %v3379_v51  ;;  %v4180_v53 = vld [vmem:[#allocation6 + $0x1d4] sm:$0xf0] }
 0x14e   :  { %v1172_v62 = vpop.f32.mrf.mxu2  ;;  %v3556_v61 = vor.u32 %v4180_v53, %v3555_v49  ;;  %v3475_v53 = vld [vmem:[#allocation6 + $0x128] sm:$0xf] }
 0x14f   :  { %v4491_v3 = vpack.c.bf16 %v1347_v59, %v1347_v59  ;;  %v1185_v4 = vpop.f32.mrf.mxu3  ;;  %v3347_v62 = vld [vmem:[#allocation6 + $0x28] sm:$0xf] }
 0x150   :  { %v1198_v13 = vpop.f32.mrf.mxu0  ;;  %2228 = vmatpush.bf16.msra.mxu3 %v3776_v43  ;;  %v4225_v4 = vld [vmem:[#allocation6 + $0x344] sm:$0xf]  ;;  %v3491_v43 = vld [vmem:[#allocation6 + $0x148] sm:$0xf] }
 0x151   :  { %2142 = vmatmul.bf16.vlgmr.msrb.gmra.mxu0 %v4491_v3  ;;  %v1211_v16 = vpop.f32.mrf.mxu1  ;;  %v3744_v7 = vor.u32 %v4225_v4, %v3741_v6  ;;  %v3523_v13 = vld [vmem:[#allocation6 + $0x188] sm:$0xf]  ;;  %v4204_v6 = vld [vmem:[#allocation6 + $0x294] sm:$0xf0] }
 0x152   :  { %2238 = vmatpush.bf16.msrb.mxu0 %v3444_v63  ;;  %v4128_v63 = vld [vmem:[#allocation6 + $0x34] sm:$0xf0] }
 0x153   :  { %v3348_v9 = vor.u32 %v4128_v63, %v3347_v62 }
 0x154   :  { %2229 = vmatpush.bf16.msra.mxu3 %v3760_v57  ;;  %v4208_v57 = vld [vmem:[#allocation6 + $0x2b4] sm:$0xf0] }
 0x155   :  { %v3668_v62 = vor.u32 %v4208_v57, %v3667_v55  ;;  %v4248_v55 = vld [vmem:[#allocation6 + $0x3f4] sm:$0xf0]  ;;  %v4166_v57 = vld [vmem:[#allocation6 + $0x16c] sm:$0xf] }
 0x156   :  { %2239 = vmatpush.bf16.msrb.mxu0 %v3428_v17  ;;  %v1222_v25 = vpop.f32.mrf.mxu2  ;;  %v4172_v17 = vld [vmem:[#allocation6 + $0x194] sm:$0xf0] }
 0x157   :  { %v1223_v28 = vadd.f32 %v1222_v25, %v1210_v24  ;;  %v1235_v29 = vpop.f32.mrf.mxu3  ;;  %v3728_v24 = vor.u32 %v4221_v18, %v3725_v19  ;;  %v3524_v27 = vor.u32 %v4172_v17, %v3523_v13  ;;  %v3652_v13 = vor.u32 %v4204_v6, %v3651_v2  ;;  %v4200_v18 = vld [vmem:[#allocation6 + $0x274] sm:$0xf0]  ;;  %v4130_v19 = vld [vmem:[#allocation6 + $0x4c] sm:$0xf] }
 0x158   :  { %2230 = vmatpush.bf16.msra.mxu3 %v3744_v7  ;;  %v4134_v7 = vld [vmem:[#allocation6 + $0x6c] sm:$0xf] }
 0x159   :  { %v1236_v34 = vadd.f32 %v1235_v29, %v1223_v28  ;;  %v1248_v35 = vpop.f32.mrf.mxu0  ;;  %v3507_v28 = vld [vmem:[#allocation6 + $0x168] sm:$0xf]  ;;  %v4168_v29 = vld [vmem:[#allocation6 + $0x174] sm:$0xf0] }
 0x15a   :  { %2240 = vmatpush.bf16.msrb.mxu0 %v3412_v26  ;;  %v1249_v58 = vadd.f32 %v1248_v35, %v489_v15  ;;  %v3332_v26 = vor.u32 %v4124_v12, %v3331_v11  ;;  %v4146_v35 = vld [vmem:[#allocation6 + $0xcc] sm:$0xf]  ;;  %v3508_v38 = vor.u32 %v4168_v29, %v3507_v28  ;;  %v3683_v15 = vld [vmem:[#allocation6 + $0x2c8] sm:$0xf]  ;;  %v490_v11 = vperm.slane %v4487_v5, 3 }
 0x15b   :  { %v1344_v39 = vmul.f32 0.2, %v1236_v34  ;;  %v3560_v29 = vor.u32 %v4178_v22, %v3557_v23  ;;  %v4206_v22 = vld [vmem:[#allocation6 + $0x2ac] sm:$0xf]  ;;  %v3669_v23 = vld [vmem:[#allocation6 + $0x2b8] sm:$0xf0] }
 0x15c   :  { %v1261_v40 = vpop.f32.mrf.mxu1  ;;  %2231 = vmatpush.bf16.msra.mxu3 %v3728_v24 }
 0x15d   :  { %v1348_v44 = vmax.f32 %v1236_v34, %v1344_v39  ;;  %v1262_v8 = vadd.f32 %v1261_v40, %v1249_v58  ;;  %v3709_v34 = vld [vmem:[#allocation6 + $0x310] sm:$0xf0]  ;;  %v4138_v58 = vld [vmem:[#allocation6 + $0x8c] sm:$0xf] }
 0x15e   :  { %2241 = vmatpush.bf16.msrb.mxu0 %v3396_v36  ;;  %v1224_v45 = vpop.f32.mrf.mxu2  ;;  %v3429_v36 = vld [vmem:[#allocation6 + $0xd8] sm:$0xf0]  ;;  %v3712_v56 = vor.u32 %v4217_v33, %v3709_v34  ;;  %v4174_v33 = vld [vmem:[#allocation6 + $0x1ac] sm:$0xf] }
 0x15f   :  { %v4495_v50 = vpack.c.bf16 %v1348_v44, %v1348_v44  ;;  %v1237_v52 = vpop.f32.mrf.mxu3  ;;  %v3432_v42 = vor.u32 %v4146_v35, %v3429_v36  ;;  %v4164_v44 = vld [vmem:[#allocation6 + $0x154] sm:$0xf0]  ;;  %v3541_v34 = vld [vmem:[#allocation6 + $0x1b8] sm:$0xf0] }
 0x160   :  { %2232 = vmatpush.bf16.msra.mxu3 %v3712_v56  ;;  %v3492_v48 = vor.u32 %v4164_v44, %v3491_v43  ;;  %v3333_v43 = vld [vmem:[#allocation6 + $0x18] sm:$0xf0]  ;;  %v4170_v44 = vld [vmem:[#allocation6 + $0x18c] sm:$0xf] }
 0x161   :  { %2155 = vmatmul.bf16.vlgmr.msrb.gmra.mxu1 %v4495_v50  ;;  %2194 = vmatmul.bf16.vlgmr.msra.gmra.mxu0 %v4491_v3  ;;  %v1250_v59 = vpop.f32.mrf.mxu0 }
 0x162   :  { %2242 = vmatpush.bf16.msrb.mxu0 %v3380_v21  ;;  %2251 = vmatpush.bf16.msrb.mxu1 %v3572_v46  ;;  %v4212_v21 = vld [vmem:[#allocation6 + $0x2d4] sm:$0xf0]  ;;  %v4142_v46 = vld [vmem:[#allocation6 + $0xac] sm:$0xf]  ;;  %v3397_v59 = vld [vmem:[#allocation6 + $0x98] sm:$0xf0] }
 0x163   :  { %v3684_v49 = vor.u32 %v4212_v21, %v3683_v15  ;;  %v3416_v52 = vor.u32 %v4142_v46, %v3413_v47  ;;  %v3400_v63 = vor.u32 %v4138_v58, %v3397_v59  ;;  %v3525_v15 = vld [vmem:[#allocation6 + $0x198] sm:$0xf0]  ;;  %v4214_v59 = vld [vmem:[#allocation6 + $0x2ec] sm:$0xf] }
 0x164   :  { %v1263_v1 = vpop.f32.mrf.mxu1  ;;  %v3509_v58 = vld [vmem:[#allocation6 + $0x178] sm:$0xf0] }
 0x165   :  { %v4156_v1 = vld [vmem:[#allocation6 + $0x114] sm:$0xf0] }
 0x166   :  { %2243 = vmatpush.bf16.msrb.mxu0 %v3364_v60  ;;  %2252 = vmatpush.bf16.msrb.mxu1 %v3556_v61  ;;  %v1274_v14 = vpop.f32.mrf.mxu2  ;;  %v3476_v60 = vor.u32 %v4160_v54, %v3475_v53  ;;  %v3460_v12 = vor.u32 %v4156_v1, %v3459_v0  ;;  %v3528_v54 = vor.u32 %v4170_v44, %v3525_v15  ;;  %v3731_v44 = vld [vmem:[#allocation6 + $0x328] sm:$0xf]  ;;  %v4224_v15 = vld [vmem:[#allocation6 + $0x334] sm:$0xf0] }
 0x167   :  { %v1287_v16 = vpop.f32.mrf.mxu3  ;;  %v1275_v20 = vadd.f32 %v1274_v14, %v1262_v8  ;;  %v3381_v8 = vld [vmem:[#allocation6 + $0x78] sm:$0xf0] }
 0x168   :  { %v3384_v14 = vor.u32 %v4134_v7, %v3381_v8  ;;  %v3811_v7 = vld [vmem:[#allocation6 + $0x3c8] sm:$0xf]  ;;  %v4244_v8 = vld [vmem:[#allocation6 + $0x3d4] sm:$0xf0] }
 0x169   :  { %v1288_v25 = vadd.f32 %v1287_v16, %v1275_v20  ;;  %v3635_v16 = vld [vmem:[#allocation6 + $0x268] sm:$0xf]  ;;  %v3365_v20 = vld [vmem:[#allocation6 + $0x58] sm:$0xf0] }
 0x16a   :  { %2244 = vmatpush.bf16.msrb.mxu0 %v3348_v9  ;;  %2253 = vmatpush.bf16.msrb.mxu1 %v3540_v10  ;;  %v4182_v9 = vld [vmem:[#allocation6 + $0x1ec] sm:$0xf]  ;;  %v3573_v10 = vld [vmem:[#allocation6 + $0x1f8] sm:$0xf0]  ;;  %v3368_v5 = vor.u32 %v4130_v19, %v3365_v20 }
 0x16b   :  { %v1345_v51 = vmul.f32 0.2, %v1288_v25  ;;  %v3576_v17 = vor.u32 %v4182_v9, %v3573_v10  ;;  %v4162_v9 = vld [vmem:[#allocation6 + $0x14c] sm:$0xf]  ;;  %v3493_v10 = vld [vmem:[#allocation6 + $0x158] sm:$0xf0] }
 0x16c   :  { %v4158_v19 = vld [vmem:[#allocation6 + $0x12c] sm:$0xf]  ;;  %v3477_v20 = vld [vmem:[#allocation6 + $0x138] sm:$0xf0] }
 0x16d   :  { %v1349_v37 = vmax.f32 %v1288_v25, %v1345_v51 }
 0x16e   :  { %2245 = vmatpush.bf16.msrb.mxu0 %v3332_v26  ;;  %2254 = vmatpush.bf16.msrb.mxu1 %v3524_v27  ;;  %v1276_v39 = vpop.f32.mrf.mxu2  ;;  %v3636_v26 = vor.u32 %v4200_v18, %v3635_v16  ;;  %v3619_v27 = vld [vmem:[#allocation6 + $0x248] sm:$0xf]  ;;  %v4240_v18 = vld [vmem:[#allocation6 + $0x3b4] sm:$0xf0] }
 0x16f   :  { %v1289_v40 = vpop.f32.mrf.mxu3  ;;  %v4499_v45 = vpack.c.bf16 %v1349_v37, %v1349_v37  ;;  %v3620_v36 = vor.u32 %v4196_v30, %v3619_v27  ;;  %v3603_v37 = vld [vmem:[#allocation6 + $0x228] sm:$0xf]  ;;  %v4154_v27 = vld [vmem:[#allocation6 + $0x10c] sm:$0xf]  ;;  %v3653_v30 = vld [vmem:[#allocation6 + $0x298] sm:$0xf0] }
 0x170   :  { %v3544_v40 = vor.u32 %v4174_v33, %v3541_v34  ;;  %v3763_v34 = vld [vmem:[#allocation6 + $0x368] sm:$0xf] }
 0x171   :  { %2207 = vmatmul.bf16.vlgmr.msra.gmra.mxu1 %v4495_v50  ;;  %2246 = vmatmul.bf16.vlgmr.msrb.gmra.mxu0 %v4491_v3 }
 0x172   :  { %2290 = vmatpush.bf16.msra.mxu0 %v3448_v31  ;;  %2168 = vmatmul.bf16.vlgmr.msrb.gmra.mxu2 %v4499_v45  ;;  %v4126_v31 = vld [vmem:[#allocation6 + $0x2c] sm:$0xf] }
 0x173   :  { %2255 = vmatpush.bf16.msrb.mxu1 %v3508_v38  ;;  %2264 = vmatpush.bf16.msrb.mxu2 %v3700_v41  ;;  %v3352_v56 = vor.u32 %v4126_v31, %v3349_v32  ;;  %v4192_v41 = vld [vmem:[#allocation6 + $0x234] sm:$0xf0] }
 0x174   :  { %v3604_v46 = vor.u32 %v4192_v41, %v3603_v37  ;;  %v3621_v41 = vld [vmem:[#allocation6 + $0x258] sm:$0xf0] }
 0x176   :  { %2291 = vmatpush.bf16.msra.mxu0 %v3432_v42  ;;  %v4122_v42 = vld [vmem:[#allocation6 + $0xc] sm:$0xf] }
 0x177   :  { %2256 = vmatpush.bf16.msrb.mxu1 %v3492_v48  ;;  %2265 = vmatpush.bf16.msrb.mxu2 %v3684_v49  ;;  %v3336_v47 = vor.u32 %v4122_v42, %v3333_v43  ;;  %v3587_v48 = vld [vmem:[#allocation6 + $0x208] sm:$0xf]  ;;  %v4188_v49 = vld [vmem:[#allocation6 + $0x214] sm:$0xf0] }
 0x179   :  { %v1300_v61 = vpop.f32.mrf.mxu0 }
 0x17a   :  { %2292 = vmatpush.bf16.msra.mxu0 %v3416_v52  ;;  %v1301_v24 = vadd.f32 %v1300_v61, %v490_v11  ;;  %v3827_v52 = vld [vmem:[#allocation6 + $0x3e8] sm:$0xf]  ;;  %v4210_v11 = vld [vmem:[#allocation6 + $0x2cc] sm:$0xf] }
 0x17b   :  { %2257 = vmatpush.bf16.msrb.mxu1 %v3476_v60  ;;  %2266 = vmatpush.bf16.msrb.mxu2 %v3668_v62  ;;  %v3701_v60 = vld [vmem:[#allocation6 + $0x2f8] sm:$0xf0]  ;;  %v3828_v0 = vor.u32 %v4248_v55, %v3827_v52  ;;  %v4220_v52 = vld [vmem:[#allocation6 + $0x314] sm:$0xf0]  ;;  %v4246_v55 = vld [vmem:[#allocation6 + $0x3ec] sm:$0xf] }
 0x17c   :  { %v1313_v4 = vpop.f32.mrf.mxu1  ;;  %v3704_v6 = vor.u32 %v4214_v59, %v3701_v60  ;;  %v4242_v60 = vld [vmem:[#allocation6 + $0x3cc] sm:$0xf] }
 0x17d   :  { %v1314_v51 = vadd.f32 %v1313_v4, %v1301_v24  ;;  %v3512_v4 = vor.u32 %v4166_v57, %v3509_v58  ;;  %v3829_v57 = vld [vmem:[#allocation6 + $0x3f8] sm:$0xf0] }
 0x17e   :  { %2293 = vmatpush.bf16.msra.mxu0 %v3400_v63  ;;  %v3588_v63 = vor.u32 %v4188_v49, %v3587_v48  ;;  %v3715_v49 = vld [vmem:[#allocation6 + $0x308] sm:$0xf]  ;;  %v3832_v59 = vor.u32 %v4246_v55, %v3829_v57 }
 0x17f   :  { %2258 = vmatpush.bf16.msrb.mxu1 %v3460_v12  ;;  %2267 = vmatpush.bf16.msrb.mxu2 %v3652_v13  ;;  %v3685_v12 = vld [vmem:[#allocation6 + $0x2d8] sm:$0xf0]  ;;  %v3812_v13 = vor.u32 %v4244_v8, %v3811_v7  ;;  %v3716_v58 = vor.u32 %v4220_v52, %v3715_v49  ;;  %v4230_v8 = vld [vmem:[#allocation6 + $0x36c] sm:$0xf]  ;;  %v4257_v49 = vld [vmem:[#allocation7 + $0x40] sm:$0xff] }
 0x180   :  { %v3688_v16 = vor.u32 %v4210_v11, %v3685_v12  ;;  %v4226_v11 = vld [vmem:[#allocation6 + $0x34c] sm:$0xf]  ;;  %v3749_v12 = vld [vmem:[#allocation6 + $0x358] sm:$0xf0]  ;;  %v4269_v52 = vld [vmem:[#allocation7 + $0xa0] sm:$0xff] }
 0x181   :  { %v1302_v25 = vpop.f32.mrf.mxu0 }
 0x182   :  { %2294 = vmatpush.bf16.msra.mxu0 %v3384_v14  ;;  %2259 = vmatmul.bf16.vlgmr.msrb.gmra.mxu1 %v4495_v50  ;;  %v3496_v14 = vor.u32 %v4162_v9, %v3493_v10  ;;  %v3672_v25 = vor.u32 %v4206_v22, %v3669_v23  ;;  %v3765_v9 = vld [vmem:[#allocation6 + $0x378] sm:$0xf0] }
 0x183   :  { %2303 = vmatpush.bf16.msra.mxu1 %v3576_v17  ;;  %2220 = vmatmul.bf16.vlgmr.msra.gmra.mxu2 %v4499_v45  ;;  %v3795_v17 = vld [vmem:[#allocation6 + $0x3a8] sm:$0xf]  ;;  %v3768_v10 = vor.u32 %v4230_v8, %v3765_v9  ;;  %v4256_v23 = vld [vmem:[#allocation7 + $0x38] sm:$0xff] }
 0x184   :  { %v1315_v28 = vpop.f32.mrf.mxu1  ;;  %2268 = vmatpush.bf16.msrb.mxu2 %v3636_v26  ;;  %v3796_v24 = vor.u32 %v4240_v18, %v3795_v17  ;;  %v3779_v26 = vld [vmem:[#allocation6 + $0x388] sm:$0xf]  ;;  %v4218_v18 = vld [vmem:[#allocation6 + $0x30c] sm:$0xf]  ;;  %v4280_v8 = vld [vmem:[#allocation7 + $0xf8] sm:$0xff] }
 0x185   :  { %v3461_v28 = vld [vmem:[#allocation6 + $0x118] sm:$0xf0] }
 0x186   :  { %v1326_v35 = vpop.f32.mrf.mxu2  ;;  %2295 = vmatpush.bf16.msra.mxu0 %v3368_v5  ;;  %v4236_v5 = vld [vmem:[#allocation6 + $0x394] sm:$0xf0]  ;;  %v3464_v32 = vor.u32 %v4154_v27, %v3461_v28  ;;  %v4253_v28 = vld [vmem:[#allocation7 + $0x20] sm:$0xff] }
 0x187   :  { %v1327_v38 = vadd.f32 %v1326_v35, %v1314_v51  ;;  %v1339_v39 = vpop.f32.mrf.mxu3  ;;  %2304 = vmatpush.bf16.msra.mxu1 %v3560_v29  ;;  %v4202_v29 = vld [vmem:[#allocation6 + $0x28c] sm:$0xf]  ;;  %v3780_v31 = vor.u32 %v4236_v5, %v3779_v26  ;;  %v4232_v51 = vld [vmem:[#allocation6 + $0x374] sm:$0xf0] }
 0x188   :  { %2269 = vmatpush.bf16.msrb.mxu2 %v3620_v36  ;;  %v3656_v33 = vor.u32 %v4202_v29, %v3653_v30  ;;  %v4198_v35 = vld [vmem:[#allocation6 + $0x26c] sm:$0xf]  ;;  %v3637_v36 = vld [vmem:[#allocation6 + $0x278] sm:$0xf0] }
 0x189   :  { %v1340_v21 = vadd.f32 %v1339_v39, %v1327_v38  ;;  %v3640_v37 = vor.u32 %v4198_v35, %v3637_v36  ;;  %v3747_v38 = vld [vmem:[#allocation6 + $0x348] sm:$0xf]  ;;  %v4228_v39 = vld [vmem:[#allocation6 + $0x354] sm:$0xf0] }
 0x18a   :  { %2296 = vmatpush.bf16.msra.mxu0 %v3352_v56  ;;  %v3764_v56 = vor.u32 %v4232_v51, %v3763_v34  ;;  %v3748_v42 = vor.u32 %v4228_v39, %v3747_v38  ;;  %v4254_v26 = vld [vmem:[#allocation7 + $0x28] sm:$0xff]  ;;  %v4252_v29 = vld [vmem:[#allocation7 + $0x18] sm:$0xff]  ;;  %v4261_v38 = vld [vmem:[#allocation7 + $0x60] sm:$0xff] }
 0x18b   :  { %v1346_v53 = vmul.f32 0.2, %v1340_v21  ;;  %2305 = vmatpush.bf16.msra.mxu1 %v3544_v40  ;;  %v4194_v40 = vld [vmem:[#allocation6 + $0x24c] sm:$0xf]  ;;  %v4264_v30 = vld [vmem:[#allocation7 + $0x78] sm:$0xff] }
 0x18c   :  { %2270 = vmatpush.bf16.msrb.mxu2 %v3604_v46  ;;  %v3624_v43 = vor.u32 %v4194_v40, %v3621_v41  ;;  %v3605_v46 = vld [vmem:[#allocation6 + $0x238] sm:$0xf0]  ;;  %v4250_v34 = vld [vmem:[#allocation7 + $0x8] sm:$0xff] }
 0x18d   :  { %v1350_v61 = vmax.f32 %v1340_v21, %v1346_v53  ;;  %v4190_v21 = vld [vmem:[#allocation6 + $0x22c] sm:$0xf]  ;;  %v4260_v39 = vld [vmem:[#allocation7 + $0x58] sm:$0xff] }
 0x18e   :  { %v1328_v62 = vpop.f32.mrf.mxu2  ;;  %2297 = vmatpush.bf16.msra.mxu0 %v3336_v47  ;;  %v3732_v47 = vor.u32 %v4224_v15, %v3731_v44  ;;  %v3608_v48 = vor.u32 %v4190_v21, %v3605_v46  ;;  %v4186_v53 = vld [vmem:[#allocation6 + $0x20c] sm:$0xf]  ;;  %v4272_v40 = vld [vmem:[#allocation7 + $0xb8] sm:$0xff] }
 0x18f   :  { %v4507_v1 = vpack.c.bf16 %v1350_v61, %v1350_v61  ;;  %v1341_v2 = vpop.f32.mrf.mxu3  ;;  %2306 = vmatpush.bf16.msra.mxu1 %v3528_v54  ;;  %v3589_v54 = vld [vmem:[#allocation6 + $0x218] sm:$0xf0]  ;;  %v4262_v51 = vld [vmem:[#allocation7 + $0x68] sm:$0xff] }
 0x190   :  { %2271 = vmatpush.bf16.msrb.mxu2 %v3588_v63  ;;  %v3813_v61 = vld [vmem:[#allocation6 + $0x3d8] sm:$0xf0]  ;;  %v4238_v63 = vld [vmem:[#allocation6 + $0x3ac] sm:$0xf] }
 0x191   :  { %2181 = vmatmul.bf16.vlgmr.msrb.gmra.mxu3 %v4507_v1  ;;  %2298 = vmatmul.bf16.vlgmr.msra.gmra.mxu0 %v4491_v3  ;;  %v3480_v3 = vor.u32 %v4158_v19, %v3477_v20  ;;  %v3816_v62 = vor.u32 %v4242_v60, %v3813_v61  ;;  %v4258_v15 = vld [vmem:[#allocation7 + $0x48] sm:$0xff] }
 0x192   :  { %2277 = vmatpush.bf16.msrb.mxu3 %v3828_v0  ;;  %v3797_v0 = vld [vmem:[#allocation6 + $0x3b8] sm:$0xf0]  ;;  %2614 = vmatpush.bf16.msrb.mxu0 %v4256_v23  ;;  %v4270_v21 = vld [vmem:[#allocation7 + $0xa8] sm:$0xff] }
 0x193   :  { %2307 = vmatpush.bf16.msra.mxu1 %v3512_v4  ;;  %2272 = vmatmul.bf16.vlgmr.msrb.gmra.mxu2 %v4499_v45  ;;  %v3800_v2 = vor.u32 %v4238_v63, %v3797_v0  ;;  %v4234_v4 = vld [vmem:[#allocation6 + $0x38c] sm:$0xf] }
 0x194   :  { %2316 = vmatpush.bf16.msra.mxu2 %v3704_v6  ;;  %v3781_v6 = vld [vmem:[#allocation6 + $0x398] sm:$0xf0]  ;;  %v4528_v46 = vld [vmem:[%s4549_s2 + $0x2] ss:$4 sm:$0xf] }
 0x195   :  { %v3784_v7 = vor.u32 %v4234_v4, %v3781_v6  ;;  %v4266_v63 = vld [vmem:[#allocation7 + $0x88] sm:$0xff]  ;;  %v1487_v9 = vperm.slane %v4528_v46, 1 }
 0x196   :  { %2278 = vmatpush.bf16.msrb.mxu3 %v3812_v13  ;;  %v3752_v13 = vor.u32 %v4226_v11, %v3749_v12  ;;  %v4279_v12 = vld [vmem:[#allocation7 + $0xf0] sm:$0xff] }
 0x197   :  { %2308 = vmatpush.bf16.msra.mxu1 %v3496_v14  ;;  %v4222_v14 = vld [vmem:[#allocation6 + $0x32c] sm:$0xf] }
 0x198   :  { %2317 = vmatpush.bf16.msra.mxu2 %v3688_v16  ;;  %v3733_v16 = vld [vmem:[#allocation6 + $0x338] sm:$0xf0] }
 0x199   :  { %v3736_v17 = vor.u32 %v4222_v14, %v3733_v16  ;;  %v4278_v16 = vld [vmem:[#allocation7 + $0xe8] sm:$0xff] }
 0x19a   :  { %2279 = vmatpush.bf16.msrb.mxu3 %v3796_v24 }
 0x19b   :  { %2309 = vmatpush.bf16.msra.mxu1 %v3480_v3 }
 0x19c   :  { %2318 = vmatpush.bf16.msra.mxu2 %v3672_v25  ;;  %v4255_v25 = vld [vmem:[#allocation7 + $0x30] sm:$0xff] }
 0x19d   :  { %2615 = vmatpush.bf16.msrb.mxu0 %v4255_v25  ;;  %v4276_v25 = vld [vmem:[#allocation7 + $0xd8] sm:$0xff] }
 0x19e   :  { %2280 = vmatpush.bf16.msrb.mxu3 %v3780_v31  ;;  %v4263_v31 = vld [vmem:[#allocation7 + $0x70] sm:$0xff] }
 0x19f   :  { %2310 = vmatpush.bf16.msra.mxu1 %v3464_v32 }
 0x1a0   :  { %2319 = vmatpush.bf16.msra.mxu2 %v3656_v33 }
 0x1a1   :  { %2233 = vmatmul.bf16.vlgmr.msra.gmra.mxu3 %v4507_v1  ;;  %2616 = vmatpush.bf16.msrb.mxu0 %v4254_v26 }
 0x1a2   :  { %2281 = vmatpush.bf16.msrb.mxu3 %v3764_v56  ;;  %2311 = vmatmul.bf16.vlgmr.msra.gmra.mxu1 %v4495_v50  ;;  %v3592_v50 = vor.u32 %v4186_v53, %v3589_v54  ;;  %v1486_v53 = vperm.slane %v4528_v46, 0  ;;  %v4268_v54 = vld [vmem:[#allocation7 + $0x98] sm:$0xff] }
 0x1a3   :  { %2627 = vmatpush.bf16.msrb.mxu1 %v4264_v30 }
 0x1a4   :  { %2320 = vmatpush.bf16.msra.mxu2 %v3640_v37  ;;  %v4249_v37 = vld [vmem:[#allocation7] sm:$0xff] }
 0x1a5   :  { %2617 = vmatpush.bf16.msrb.mxu0 %v4253_v28 }
 0x1a6   :  { %2282 = vmatpush.bf16.msrb.mxu3 %v3748_v42  ;;  %v4259_v42 = vld [vmem:[#allocation7 + $0x50] sm:$0xff] }
 0x1a7   :  { %2628 = vmatpush.bf16.msrb.mxu1 %v4263_v31 }
 0x1a8   :  { %2321 = vmatpush.bf16.msra.mxu2 %v3624_v43  ;;  %v4271_v43 = vld [vmem:[#allocation7 + $0xb0] sm:$0xff] }
 0x1a9   :  { %2618 = vmatpush.bf16.msrb.mxu0 %v4252_v29 }
 0x1aa   :  { %2283 = vmatpush.bf16.msrb.mxu3 %v3732_v47 }
 0x1ab   :  { %2629 = vmatpush.bf16.msrb.mxu1 %v4262_v51 }
 0x1ac   :  { %2322 = vmatpush.bf16.msra.mxu2 %v3608_v48 }
 0x1ae   :  { %2284 = vmatpush.bf16.msrb.mxu3 %v3716_v58  ;;  %v4267_v58 = vld [vmem:[#allocation7 + $0x90] sm:$0xff] }
 0x1af   :  { %2630 = vmatpush.bf16.msrb.mxu1 %v4261_v38 }
 0x1b0   :  { %2323 = vmatpush.bf16.msra.mxu2 %v3592_v50 }
 0x1b1   :  { %2285 = vmatmul.bf16.vlgmr.msrb.gmra.mxu3 %v4507_v1 }
 0x1b2   :  { %2329 = vmatpush.bf16.msra.mxu3 %v3832_v59 }
 0x1b3   :  { %2324 = vmatmul.bf16.vlgmr.msra.gmra.mxu2 %v4499_v45  ;;  %v3717_v45 = vld [vmem:[#allocation6 + $0x318] sm:$0xf0]  ;;  %2631 = vmatpush.bf16.msrb.mxu1 %v4260_v39 }
 0x1b4   :  { %v3720_v19 = vor.u32 %v4218_v18, %v3717_v45  ;;  %2640 = vmatpush.bf16.msrb.mxu2 %v4272_v40  ;;  %v1489_v40 = vperm.slane %v4528_v46, 3 }
 0x1b6   :  { %2330 = vmatpush.bf16.msra.mxu3 %v3816_v62 }
 0x1b7   :  { %2632 = vmatpush.bf16.msrb.mxu1 %v4259_v42 }
 0x1b8   :  { %2641 = vmatpush.bf16.msrb.mxu2 %v4271_v43 }
 0x1ba   :  { %2331 = vmatpush.bf16.msra.mxu3 %v3800_v2 }
 0x1bb   :  { %2633 = vmatpush.bf16.msrb.mxu1 %v4258_v15 }
 0x1bc   :  { %2642 = vmatpush.bf16.msrb.mxu2 %v4270_v21 }
 0x1be   :  { %2332 = vmatpush.bf16.msra.mxu3 %v3784_v7  ;;  %v4265_v7 = vld [vmem:[#allocation7 + $0x80] sm:$0xff] }
 0x1bf   :  { %2634 = vmatpush.bf16.msrb.mxu1 %v4257_v49 }
 0x1c0   :  { %2643 = vmatpush.bf16.msrb.mxu2 %v4269_v52 }
 0x1c2   :  { %2333 = vmatpush.bf16.msra.mxu3 %v3768_v10 }
 0x1c4   :  { %2644 = vmatpush.bf16.msrb.mxu2 %v4268_v54 }
 0x1c6   :  { %2334 = vmatpush.bf16.msra.mxu3 %v3752_v13 }
 0x1c8   :  { %2645 = vmatpush.bf16.msrb.mxu2 %v4267_v58 }
 0x1ca   :  { %2335 = vmatpush.bf16.msra.mxu3 %v3736_v17 }
 0x1cc   :  { %2646 = vmatpush.bf16.msrb.mxu2 %v4266_v63 }
 0x1ce   :  { %2336 = vmatpush.bf16.msra.mxu3 %v3720_v19  ;;  %v2143_v20 = vpop.f32.mrf.mxu0  ;;  %v4277_v19 = vld [vmem:[#allocation7 + $0xe0] sm:$0xff] }
 0x1cf   :  { %v2144_v57 = vadd.f32 %v2143_v20, %v1486_v53 }
 0x1d0   :  { %2647 = vmatpush.bf16.msrb.mxu2 %v4265_v7 }
 0x1d1   :  { %2337 = vmatmul.bf16.vlgmr.msra.gmra.mxu3 %v4507_v1  ;;  %v4251_v1 = vld [vmem:[#allocation7 + $0x10] sm:$0xff] }
 0x1d2   :  { %2619 = vmatpush.bf16.msrb.mxu0 %v4251_v1  ;;  %2653 = vmatpush.bf16.msrb.mxu3 %v4280_v8  ;;  %v4274_v1 = vld [vmem:[#allocation7 + $0xc8] sm:$0xff] }
 0x1d6   :  { %v2145_v22 = vpop.f32.mrf.mxu0  ;;  %2620 = vmatpush.bf16.msrb.mxu0 %v4250_v34  ;;  %2654 = vmatpush.bf16.msrb.mxu3 %v4279_v12 }
 0x1da   :  { %2621 = vmatpush.bf16.msrb.mxu0 %v4249_v37  ;;  %2655 = vmatpush.bf16.msrb.mxu3 %v4278_v16 }
 0x1de   :  { %v2156_v24 = vpop.f32.mrf.mxu1  ;;  %v4517_v3 = vpop.f32.mrf.mxu0  ;;  %2656 = vmatpush.bf16.msrb.mxu3 %v4277_v19 }
 0x1df   :  { %v2157_v59 = vadd.f32 %v2156_v24, %v2144_v57  ;;  %v2196_v13 = vadd.f32 %v4517_v3, %v1487_v9  ;;  %v4275_v3 = vld [vmem:[#allocation7 + $0xd0] sm:$0xff] }
 0x1e2   :  { %2657 = vmatpush.bf16.msrb.mxu3 %v4276_v25 }
 0x1e6   :  { %v2158_v5 = vpop.f32.mrf.mxu1  ;;  %v2197_v27 = vpop.f32.mrf.mxu0  ;;  %2658 = vmatpush.bf16.msrb.mxu3 %v4275_v3 }
 0x1e7   :  { %v1488_v5 = vperm.slane %v4528_v46, 2  ;;  %v4289_v46 = vld [vmem:[%s4553_s6] ss:$0 sm:$0xff] }
 0x1ea   :  { %2659 = vmatpush.bf16.msrb.mxu3 %v4274_v1 }
 0x1ee   :  { %v4519_v32 = vpop.f32.mrf.mxu1  ;;  %v4521_v33 = vpop.f32.mrf.mxu0 }
 0x1ef   :  { %v2209_v18 = vadd.f32 %v4519_v32, %v2196_v13  ;;  %v2248_v29 = vadd.f32 %v4521_v33, %v1488_v5 }
 0x1f5   :  { %v2169_v35 = vpop.f32.mrf.mxu2 }
 0x1f6   :  { %v2210_v36 = vpop.f32.mrf.mxu1  ;;  %v2249_v56 = vpop.f32.mrf.mxu0  ;;  %v2170_v60 = vadd.f32 %v2169_v35, %v2157_v59  ;;  %v4273_v35 = vld [vmem:[#allocation7 + $0xc0] sm:$0xff] }
 0x1f7   :  { %2660 = vmatpush.bf16.msrb.mxu3 %v4273_v35 }
 0x1fd   :  { %v2171_v41 = vpop.f32.mrf.mxu2 }
 0x1ff   :  { %v4523_v44 = vpop.f32.mrf.mxu1 }
 0x200   :  { %v2261_v30 = vadd.f32 %v4523_v44, %v2248_v29 }
 0x206   :  { %v2221_v47 = vpop.f32.mrf.mxu2 }
 0x207   :  { %v2262_v48 = vpop.f32.mrf.mxu1  ;;  %v2222_v45 = vadd.f32 %v2221_v47, %v2209_v18 }
 0x20e   :  { %v4531_v55 = vpop.f32.mrf.mxu0  ;;  %v2223_v50 = vpop.f32.mrf.mxu2 }
 0x20f   :  { %v2300_v33 = vadd.f32 %v4531_v55, %v1489_v40 }
 0x214   :  { %v2182_v61 = vpop.f32.mrf.mxu3 }
 0x215   :  { %v2183_v62 = vadd.f32 %v2182_v61, %v2170_v60 }
 0x216   :  { %v2301_v0 = vpop.f32.mrf.mxu0  ;;  %v2273_v4 = vpop.f32.mrf.mxu2 }
 0x217   :  { %v2342_v2 = vmul.f32 0.2, %v2183_v62  ;;  %v2274_v31 = vadd.f32 %v2273_v4, %v2261_v30 }
 0x219   :  { %v2346_v6 = vmax.f32 %v2183_v62, %v2342_v2 }
 0x21b   :  { %v2350_v10 = vpack.c.bf16 %v2346_v6, %v2346_v6 }
 0x21c   :  { %v2184_v11 = vpop.f32.mrf.mxu3 }
 0x21d   :  { %2622 = vmatmul.bf16.vlgmr.msrb.gmra.mxu0 %v2350_v10 }
 0x21e   :  { %v2275_v17 = vpop.f32.mrf.mxu2 }
 0x21f   :  { %v2312_v14 = vpop.f32.mrf.mxu1 }
 0x220   :  { %v2313_v41 = vadd.f32 %v2312_v14, %v2300_v33 }
 0x224   :  { %v2234_v20 = vpop.f32.mrf.mxu3 }
 0x225   :  { %v2235_v22 = vadd.f32 %v2234_v20, %v2222_v45 }
 0x227   :  { %v2343_v23 = vmul.f32 0.2, %v2235_v22  ;;  %v2314_v24 = vpop.f32.mrf.mxu1 }
 0x229   :  { %v2347_v26 = vmax.f32 %v2235_v22, %v2343_v23 }
 0x22b   :  { %v2351_v27 = vpack.c.bf16 %v2347_v26, %v2347_v26 }
 0x22c   :  { %v2236_v28 = vpop.f32.mrf.mxu3 }
 0x22d   :  { %2635 = vmatmul.bf16.vlgmr.msrb.gmra.mxu1 %v2351_v27 }
 0x234   :  { %v2286_v32 = vpop.f32.mrf.mxu3 }
 0x235   :  { %v2287_v34 = vadd.f32 %v2286_v32, %v2274_v31 }
 0x236   :  { %v2325_v51 = vpop.f32.mrf.mxu2 }
 0x237   :  { %v2344_v36 = vmul.f32 0.2, %v2287_v34  ;;  %v2326_v42 = vadd.f32 %v2325_v51, %v2313_v41 }
 0x239   :  { %v2348_v56 = vmax.f32 %v2287_v34, %v2344_v36 }
 0x23b   :  { %v2352_v37 = vpack.c.bf16 %v2348_v56, %v2348_v56 }
 0x23c   :  { %v2288_v38 = vpop.f32.mrf.mxu3 }
 0x23d   :  { %2648 = vmatmul.bf16.vlgmr.msrb.gmra.mxu2 %v2352_v37 }
 0x23e   :  { %v2327_v39 = vpop.f32.mrf.mxu2 }
 0x254   :  { %v2338_v43 = vpop.f32.mrf.mxu3 }
 0x255   :  { %v2339_v44 = vadd.f32 %v2338_v43, %v2326_v42 }
 0x257   :  { %v2345_v15 = vmul.f32 0.2, %v2339_v44 }
 0x259   :  { %v2349_v21 = vmax.f32 %v2339_v44, %v2345_v15 }
 0x25b   :  { %v2353_v47 = vpack.c.bf16 %v2349_v21, %v2349_v21 }
 0x25c   :  { %v2340_v48 = vpop.f32.mrf.mxu3 }
 0x25d   :  { %2661 = vmatmul.bf16.vlgmr.msrb.gmra.mxu3 %v2353_v47 }
 0x29a   :  { %v2623_v49 = vpop.f32.mrf.mxu0 }
 0x29b   :  { %v2624_v55 = vadd.f32 %v4289_v46, %v2623_v49 }
 0x2a2   :  { %v2625_v52 = vpop.f32.mrf.mxu0 }
 0x2aa   :  { %v2636_v53 = vpop.f32.mrf.mxu1 }
 0x2ab   :  { %v2637_v50 = vadd.f32 %v2636_v53, %v2624_v55 }
 0x2b2   :  { %v2638_v54 = vpop.f32.mrf.mxu1 }
 0x2c0   :  { %v2649_v57 = vpop.f32.mrf.mxu2 }
 0x2c1   :  { %v2650_v59 = vadd.f32 %v2649_v57, %v2637_v50 }
 0x2c8   :  { %v2651_v58 = vpop.f32.mrf.mxu2 }
 0x2e0   :  { %v2662_v60 = vpop.f32.mrf.mxu3 }
 0x2e1   :  { %v2663_v61 = vadd.f32 %v2662_v60, %v2650_v59 }
 0x2e3   :  { %v2666_v62 = vmul.f32 0.5, %v2663_v61 }
 0x2e5   :  { %4290 = vtanh.f32 %v2666_v62 }
 0x2e8   :  { %v2664_v63 = vpop.f32.mrf.mxu3 }
 0x2eb   :  { %v4291_v0 = vpop.eup %4290 }
 0x2ec   :  { %v2668_v2 = vmul.f32 0.5, %v4291_v0 }
 0x2ee   :  { %v2669_v4 = vadd.f32 0.5, %v2668_v2 }
 0x2f0   :  { %2671 = vst.msk [vmem:[%s4554_s7] sm:$0xff] %vm2670_vm0, %v2669_v4 }
 0x2f1   :  { %2676 = vsyncpa [#allocation3], 1 }
 0x2f2   :  { %2677 = vsyncpa [#allocation5], 1 }
 0x2f3   :  { %2678 = vsyncpa [#allocation8], 1 }

</bundles_post_ra>
